<compile_context>
chip_gen: v6e
topology: v6e:2x2x1
jax: 0.10.0
libtpu: 0.0.40
codegen_flags: <defaults>
</compile_context>

<pallas_src>
import functools

import jax
import jax.numpy as jnp
import numpy as np
from jax.experimental import pallas as pl
from jax.experimental.pallas import tpu as pltpu

LANE = 128


def _round_up(x, m):
    return (x + m - 1) // m * m


def _vmem_capacity_bytes():
    try:
        return int(pltpu.get_tpu_info().vmem_capacity_bytes)
    except Exception:
        return 64 * 2**20   # conservative default (v7x-sized)


def _default_tap_group():
    # v5e MXU is 128-deep: per-tap K=128 already fills it.  v6e/v7x MXUs are
    # 256-deep: pair taps so each conv2 matmul has K >= 256.
    try:
        kind = jax.devices()[0].device_kind.lower()
    except Exception:
        return 2
    return 1 if ("v5 lite" in kind or "v5e" in kind) else 2


# ----------------------------------------------------------------------------
# Pallas kernel: one full Bottleneck block for a block of `nb` images
# ----------------------------------------------------------------------------
def bottleneck_kernel(x_ref, w1_ref, s1_ref, b1_ref,
                      w2_ref, s2_ref, b2_ref,
                      w3_ref, s3_ref, b3_ref,
                      o_ref, ypad_ref, *, tap_group):
    Nb, H, W, C = x_ref.shape          # C = padded inplanes = padded 4*planes
    P = w1_ref.shape[1]                # padded planes
    M = Nb * H * W

    # -------- load input block, flatten spatial dims for the 1x1 convs ------
    xf = x_ref[...].reshape(M, C)                                # bf16 (M, C)

    # -------- conv1 (1x1) + bn1 + relu  (bf16 x bf16 -> f32 acc) ------------
    y1 = jnp.dot(xf, w1_ref[...], preferred_element_type=jnp.float32)
    y1 = jnp.maximum(y1 * s1_ref[...] + b1_ref[...], 0.0)        # f32 (M, P)

    # -------- conv2 (3x3, stride=1, dilation=1, pad=1) ----------------------
    # Keep the 1-px halo zero by rewriting only the thin border strips each
    # step (cheap); the interior is fully rewritten every iteration.  Not
    # gated on program_id==0 because with "parallel" semantics each core has
    # its own scratch instance.
    zrow = jnp.zeros((Nb, 1, W + 2, P), ypad_ref.dtype)
    zcol = jnp.zeros((Nb, H + 2, 1, P), ypad_ref.dtype)
    ypad_ref[:, pl.ds(0, 1), :, :] = zrow                        # top halo
    ypad_ref[:, pl.ds(H + 1, 1), :, :] = zrow                    # bottom halo
    ypad_ref[:, :, pl.ds(0, 1), :] = zcol                        # left halo
    ypad_ref[:, :, pl.ds(W + 1, 1), :] = zcol                    # right halo
    ypad_ref[:, pl.ds(1, H), pl.ds(1, W), :] = (
        y1.astype(ypad_ref.dtype).reshape(Nb, H, W, P))

    # Accumulated MXU matmuls over the 9 taps, `tap_group` taps per call
    # (K = tap_group * P): no (M, 9P) im2col materialization.
    taps = [(ky, kx) for ky in range(3) for kx in range(3)]
    acc = jnp.zeros((M, P), jnp.float32)
    for g0 in range(0, 9, tap_group):
        gsz = min(tap_group, 9 - g0)
        parts = [ypad_ref[:, pl.ds(ky, H), pl.ds(kx, W), :].reshape(M, P)
                 for (ky, kx) in taps[g0:g0 + gsz]]
        lhs = parts[0] if gsz == 1 else jnp.concatenate(parts, axis=-1)
        acc = acc + jnp.dot(lhs, w2_ref[pl.ds(g0 * P, gsz * P), :],
                            preferred_element_type=jnp.float32)
    y2 = jnp.maximum(acc * s2_ref[...] + b2_ref[...], 0.0)       # f32 (M, P)

    # -------- conv3 (1x1) + bn3 ---------------------------------------------
    y3 = jnp.dot(y2.astype(jnp.bfloat16), w3_ref[...],
                 preferred_element_type=jnp.float32)
    y3 = y3 * s3_ref[...] + b3_ref[...]                          # f32 (M, C)

    # -------- residual add (downsample is None) + relu ----------------------
    out = jnp.maximum(y3 + xf.astype(jnp.float32), 0.0)
    o_ref[...] = out.reshape(Nb, H, W, C).astype(o_ref.dtype)


# ----------------------------------------------------------------------------
# Wrapper: channel padding to lane multiples, bf16 operands, pallas_call
# ----------------------------------------------------------------------------
@functools.partial(jax.jit, static_argnames=("nb", "tap_group"))
def bottleneck_pallas_nhwc(x_nhwc, w1, s1, b1, w2, s2, b2, w3, s3, b3,
                           *, nb=1, tap_group=None):
    N, H, W, Cin = x_nhwc.shape
    P = w1.shape[1]
    Cout = 4 * P
    assert Cin == Cout, "residual add requires inplanes == 4*planes (downsample=None)"
    assert N % nb == 0, "batch must be divisible by nb"
    if tap_group is None:
        tap_group = _default_tap_group()
    assert 1 <= tap_group <= 9

    Pp = _round_up(P, LANE)            # padded planes (lane dense)
    Cp = _round_up(Cin, LANE)          # padded in/out channels (lane dense)

    # zero-pad channels (extra channels stay exactly zero end-to-end); bf16
    # matmul operands, f32 BN scale/bias.
    xq = jnp.pad(x_nhwc, ((0, 0), (0, 0), (0, 0), (0, Cp - Cin))).astype(jnp.bfloat16)
    w1p = jnp.pad(w1, ((0, Cp - Cin), (0, Pp - P))).astype(jnp.bfloat16)      # (Cp, Pp)
    w2p = jnp.pad(w2, ((0, 0), (0, 0), (0, Pp - P), (0, Pp - P)))             # (3,3,Pp,Pp) HWIO
    w2p = w2p.astype(jnp.bfloat16).reshape(9 * Pp, Pp)                        # (9Pp, Pp)
    w3p = jnp.pad(w3, ((0, Pp - P), (0, Cp - Cout))).astype(jnp.bfloat16)     # (Pp, Cp)
    s1p = jnp.pad(s1, ((0, 0), (0, Pp - P)))
    b1p = jnp.pad(b1, ((0, 0), (0, Pp - P)))
    s2p = jnp.pad(s2, ((0, 0), (0, Pp - P)))
    b2p = jnp.pad(b2, ((0, 0), (0, Pp - P)))
    s3p = jnp.pad(s3, ((0, 0), (0, Cp - Cout)))
    b3p = jnp.pad(b3, ((0, 0), (0, Cp - Cout)))

    flops = 2 * N * H * W * (Cp * Pp + 9 * Pp * Pp + Pp * Cp)
    bytes_accessed = (xq.size * 2
                      + (w1p.size + w2p.size + w3p.size) * 2
                      + (s1p.size + b1p.size + s2p.size + b2p.size
                         + s3p.size + b3p.size) * 4
                      + N * H * W * Cp * 2)                       # bf16 output

    # rough per-step VMEM budget
    M = nb * H * W
    block_bytes = (2 * M * Cp * 2                                 # input (2 bufs)
                   + 2 * M * Cp * 2                               # output (2 bufs)
                   + 2 * (w1p.size + w2p.size + w3p.size) * 2     # weights (2 bufs)
                   + 2 * 6 * max(Pp, Cp) * 4                      # scales/biases
                   + nb * (H + 2) * (W + 2) * Pp * 2              # bf16 halo scratch
                   + M * (3 * Pp + 2 * Cp) * 4                    # live f32 intermediates
                   + 2 * M * tap_group * Pp * 2)                  # bf16 tap staging
    vmem_cap = int(0.85 * _vmem_capacity_bytes())                 # headroom for compiler scratch
    vmem_limit = int(min(vmem_cap, max(32 * 2**20, 2 * block_bytes)))

    kernel = functools.partial(bottleneck_kernel, tap_group=tap_group)

    out = pl.pallas_call(
        kernel,
        out_shape=jax.ShapeDtypeStruct((N, H, W, Cp), jnp.bfloat16),
        grid=(N // nb,),
        in_specs=[
            pl.BlockSpec((nb, H, W, Cp), lambda n: (n, 0, 0, 0)),   # x (bf16)
            # constant index_maps -> weights/scales are DMA'd once, not per step
            pl.BlockSpec((Cp, Pp),       lambda n: (0, 0)),         # conv1 weight
            pl.BlockSpec((1, Pp),        lambda n: (0, 0)),         # bn1 scale
            pl.BlockSpec((1, Pp),        lambda n: (0, 0)),         # bn1 bias
            pl.BlockSpec((9 * Pp, Pp),   lambda n: (0, 0)),         # conv2 weight (tap-major)
            pl.BlockSpec((1, Pp),        lambda n: (0, 0)),         # bn2 scale
            pl.BlockSpec((1, Pp),        lambda n: (0, 0)),         # bn2 bias
            pl.BlockSpec((Pp, Cp),       lambda n: (0, 0)),         # conv3 weight
            pl.BlockSpec((1, Cp),        lambda n: (0, 0)),         # bn3 scale
            pl.BlockSpec((1, Cp),        lambda n: (0, 0)),         # bn3 bias
        ],
        out_specs=pl.BlockSpec((nb, H, W, Cp), lambda n: (n, 0, 0, 0)),
        scratch_shapes=[pltpu.VMEM((nb, H + 2, W + 2, Pp), jnp.bfloat16)],
        compiler_params=pltpu.CompilerParams(
            dimension_semantics=("parallel",),
            vmem_limit_bytes=vmem_limit),
        cost_estimate=pl.CostEstimate(flops=flops, transcendentals=0,
                                      bytes_accessed=bytes_accessed),
    )(xq, w1p, s1p, b1p, w2p, s2p, b2p, w3p, s3p, b3p)

    return out[..., :Cout]


def bottleneck_pallas_nchw(x_nchw, params, nb=1, tap_group=None):
    # TODO(synk): keep the surrounding network in NHWC to drop these two
    # full-tensor transposes (each is an extra HBM read+write pass).
    x_nhwc = jnp.transpose(x_nchw, (0, 2, 3, 1))
    out_nhwc = bottleneck_pallas_nhwc(x_nhwc, *params, nb=nb, tap_group=tap_group)
    return jnp.transpose(out_nhwc, (0, 3, 1, 2)).astype(x_nchw.dtype)


# ----------------------------------------------------------------------------
# Pure-JAX reference (mirrors the kernel's bf16 operand/output quantization)
# ----------------------------------------------------------------------------
def bottleneck_ref_nhwc(x, w1, s1, b1, w2, s2, b2, w3, s3, b3):
    bf = lambda a: a.astype(jnp.bfloat16).astype(jnp.float32)
    hp = jax.lax.Precision.HIGHEST
    xq = bf(x)
    y = jnp.einsum('nhwc,co->nhwo', xq, bf(w1), precision=hp)
    y = bf(jnp.maximum(y * s1 + b1, 0.0))
    y = jax.lax.conv_general_dilated(
        y, bf(w2), window_strides=(1, 1), padding=((1, 1), (1, 1)),
        dimension_numbers=('NHWC', 'HWIO', 'NHWC'), precision=hp)
    y = bf(jnp.maximum(y * s2 + b2, 0.0))
    y = jnp.einsum('nhwc,co->nhwo', y, bf(w3), precision=hp)
    y = y * s3 + b3
    return bf(jnp.maximum(y + xq, 0.0))     # kernel stores bf16


# ----------------------------------------------------------------------------
# Deterministic parameter construction (eval-mode BN folded to scale/bias)
# ----------------------------------------------------------------------------
def make_params(key, inplanes, planes, eps=1e-5):
    ks = jax.random.split(key, 16)
    f32 = jnp.float32

    def bn_fold(kg, kb, km, kv, c):
        gamma = 0.5 + jax.random.uniform(kg, (1, c), f32)
        beta = 0.1 * jax.random.normal(kb, (1, c), f32)
        mean = 0.1 * jax.random.normal(km, (1, c), f32)
        var = 0.5 + jax.random.uniform(kv, (1, c), f32)
        scale = gamma / jnp.sqrt(var + eps)
        bias = beta - mean * scale
        return scale, bias

    w1 = 0.1 * jax.random.normal(ks[0], (inplanes, planes), f32)           # 1x1, (Cin, P)
    s1, b1 = bn_fold(ks[1], ks[2], ks[3], ks[4], planes)
    w2 = 0.1 * jax.random.normal(ks[5], (3, 3, planes, planes), f32)       # 3x3, HWIO
    s2, b2 = bn_fold(ks[6], ks[7], ks[8], ks[9], planes)
    w3 = 0.1 * jax.random.normal(ks[10], (planes, 4 * planes), f32)        # 1x1, (P, 4P)
    s3, b3 = bn_fold(ks[11], ks[12], ks[13], ks[14], 4 * planes)
    return (w1, s1, b1, w2, s2, b2, w3, s3, b3)


if __name__ == "__main__":
    key = jax.random.PRNGKey(0)
    kx, kp = jax.random.split(key)

    # small shapes: batch=2, inplanes=16, planes=4 (expansion 4 -> out=16), 8x8 spatial
    N, inplanes, planes, H, W = 2, 16, 4, 8, 8
    x_nchw = jax.random.normal(kx, (N, inplanes, H, W), jnp.float32)
    params = make_params(kp, inplanes, planes)

    x_nhwc = jnp.transpose(x_nchw, (0, 2, 3, 1))
    ref = jnp.transpose(bottleneck_ref_nhwc(x_nhwc, *params), (0, 3, 1, 2))

    # nb=1 -> 2-step grid (keeps both TCs busy on v7x), default tap grouping;
    # nb=2 -> single batched block, per-tap (v5e-style) conv2 path.
    for nb, tg in ((1, None), (2, 1)):
        out = bottleneck_pallas_nchw(x_nchw, params, nb=nb, tap_group=tg)
        out = jax.block_until_ready(out)
        assert out.shape == (N, 4 * planes, H, W)
        np.testing.assert_allclose(np.asarray(out), np.asarray(ref),
                                   rtol=1e-2, atol=1e-2)

    print("KERNEL_OK")
</pallas_src>

<mosaic_0001>
module attributes {stable_mosaic.version = 11 : i64} {
  func.func @bottleneck_kernel(%arg0: i32, %arg1: memref<1x8x8x128xbf16, #tpu.memory_space<vmem>>, %arg2: memref<128x128xbf16, #tpu.memory_space<vmem>>, %arg3: memref<1x128xf32, #tpu.memory_space<vmem>>, %arg4: memref<1x128xf32, #tpu.memory_space<vmem>>, %arg5: memref<1152x128xbf16, #tpu.memory_space<vmem>>, %arg6: memref<1x128xf32, #tpu.memory_space<vmem>>, %arg7: memref<1x128xf32, #tpu.memory_space<vmem>>, %arg8: memref<128x128xbf16, #tpu.memory_space<vmem>>, %arg9: memref<1x128xf32, #tpu.memory_space<vmem>>, %arg10: memref<1x128xf32, #tpu.memory_space<vmem>>, %arg11: memref<1x8x8x128xbf16, #tpu.memory_space<vmem>>, %arg12: memref<1x10x10x128xbf16, #tpu.memory_space<vmem>>) attributes {dimension_semantics = [#tpu.dimension_semantics<parallel>], iteration_bounds = array<i64: 2>, scalar_prefetch = 0 : i64, scratch_operands = 1 : i64, tpu.core_type = #tpu.core_type<tc>, window_params = [{transform_indices = @transform_0, window_bounds = array<i64: 1, 8, 8, 128>}, {pipeline_mode = #tpu.pipeline_mode<synchronous>, transform_indices = @transform_1, window_bounds = array<i64: 128, 128>}, {pipeline_mode = #tpu.pipeline_mode<synchronous>, transform_indices = @transform_2, window_bounds = array<i64: 1, 128>}, {pipeline_mode = #tpu.pipeline_mode<synchronous>, transform_indices = @transform_3, window_bounds = array<i64: 1, 128>}, {pipeline_mode = #tpu.pipeline_mode<synchronous>, transform_indices = @transform_4, window_bounds = array<i64: 1152, 128>}, {pipeline_mode = #tpu.pipeline_mode<synchronous>, transform_indices = @transform_5, window_bounds = array<i64: 1, 128>}, {pipeline_mode = #tpu.pipeline_mode<synchronous>, transform_indices = @transform_6, window_bounds = array<i64: 1, 128>}, {pipeline_mode = #tpu.pipeline_mode<synchronous>, transform_indices = @transform_7, window_bounds = array<i64: 128, 128>}, {pipeline_mode = #tpu.pipeline_mode<synchronous>, transform_indices = @transform_8, window_bounds = array<i64: 1, 128>}, {pipeline_mode = #tpu.pipeline_mode<synchronous>, transform_indices = @transform_9, window_bounds = array<i64: 1, 128>}, {transform_indices = @transform_10, window_bounds = array<i64: 1, 8, 8, 128>}]} {
    %c0 = arith.constant 0 : index
    %c0_0 = arith.constant 0 : index
    %c0_1 = arith.constant 0 : index
    %c0_2 = arith.constant 0 : index
    %0 = vector.load %arg1[%c0, %c0_0, %c0_1, %c0_2] : memref<1x8x8x128xbf16, #tpu.memory_space<vmem>>, vector<1x8x8x128xbf16>
    %1 = vector.shape_cast %0 : vector<1x8x8x128xbf16> to vector<64x128xbf16>
    %c0_3 = arith.constant 0 : index
    %c0_4 = arith.constant 0 : index
    %2 = vector.load %arg2[%c0_3, %c0_4] : memref<128x128xbf16, #tpu.memory_space<vmem>>, vector<128x128xbf16>
    %cst = arith.constant dense<0.000000e+00> : vector<64x128xf32>
    %3 = tpu.matmul %1, %2, %cst {dimension_numbers = #tpu.dot_dimension_numbers<[1], [0], [0], [1], [0, 0, 1, 1], [], []>} : vector<64x128xbf16>, vector<128x128xbf16>, vector<64x128xf32> -> vector<64x128xf32>
    %c0_5 = arith.constant 0 : index
    %c0_6 = arith.constant 0 : index
    %4 = vector.load %arg3[%c0_5, %c0_6] : memref<1x128xf32, #tpu.memory_space<vmem>>, vector<1x128xf32>
    %5 = vector.broadcast %4 : vector<1x128xf32> to vector<64x128xf32>
    %6 = arith.mulf %3, %5 : vector<64x128xf32>
    %c0_7 = arith.constant 0 : index
    %c0_8 = arith.constant 0 : index
    %7 = vector.load %arg4[%c0_7, %c0_8] : memref<1x128xf32, #tpu.memory_space<vmem>>, vector<1x128xf32>
    %8 = vector.broadcast %7 : vector<1x128xf32> to vector<64x128xf32>
    %9 = arith.addf %6, %8 : vector<64x128xf32>
    %cst_9 = arith.constant 0.000000e+00 : f32
    %10 = vector.broadcast %cst_9 : f32 to vector<64x128xf32>
    %11 = arith.maximumf %9, %10 : vector<64x128xf32>
    %cst_10 = arith.constant 0.000000e+00 : bf16
    %12 = vector.broadcast %cst_10 : bf16 to vector<1x1x10x128xbf16>
    %cst_11 = arith.constant 0.000000e+00 : bf16
    %13 = vector.broadcast %cst_11 : bf16 to vector<1x10x1x128xbf16>
    %c0_12 = arith.constant 0 : index
    %c0_13 = arith.constant 0 : index
    %c0_14 = arith.constant 0 : index
    %c0_15 = arith.constant 0 : index
    %14 = vector.load %arg12[%c0_12, %c0_13, %c0_14, %c0_15] : memref<1x10x10x128xbf16, #tpu.memory_space<vmem>>, vector<1x1x10x128xbf16>
    tpu.vector_store %arg12[%c0_12, %c0_13, %c0_14, %c0_15], %12 {strides = array<i32>} : memref<1x10x10x128xbf16, #tpu.memory_space<vmem>>, vector<1x1x10x128xbf16>,
    %c0_16 = arith.constant 0 : index
    %c9 = arith.constant 9 : index
    %c0_17 = arith.constant 0 : index
    %c0_18 = arith.constant 0 : index
    %15 = vector.load %arg12[%c0_16, %c9, %c0_17, %c0_18] : memref<1x10x10x128xbf16, #tpu.memory_space<vmem>>, vector<1x1x10x128xbf16>
    tpu.vector_store %arg12[%c0_16, %c9, %c0_17, %c0_18], %12 {strides = array<i32>} : memref<1x10x10x128xbf16, #tpu.memory_space<vmem>>, vector<1x1x10x128xbf16>,
    %c0_19 = arith.constant 0 : index
    %c0_20 = arith.constant 0 : index
    %c0_21 = arith.constant 0 : index
    %c0_22 = arith.constant 0 : index
    %16 = vector.load %arg12[%c0_19, %c0_20, %c0_21, %c0_22] : memref<1x10x10x128xbf16, #tpu.memory_space<vmem>>, vector<1x10x1x128xbf16>
    tpu.vector_store %arg12[%c0_19, %c0_20, %c0_21, %c0_22], %13 {strides = array<i32>} : memref<1x10x10x128xbf16, #tpu.memory_space<vmem>>, vector<1x10x1x128xbf16>,
    %c0_23 = arith.constant 0 : index
    %c0_24 = arith.constant 0 : index
    %c9_25 = arith.constant 9 : index
    %c0_26 = arith.constant 0 : index
    %17 = vector.load %arg12[%c0_23, %c0_24, %c9_25, %c0_26] : memref<1x10x10x128xbf16, #tpu.memory_space<vmem>>, vector<1x10x1x128xbf16>
    tpu.vector_store %arg12[%c0_23, %c0_24, %c9_25, %c0_26], %13 {strides = array<i32>} : memref<1x10x10x128xbf16, #tpu.memory_space<vmem>>, vector<1x10x1x128xbf16>,
    %18 = arith.truncf %11 : vector<64x128xf32> to vector<64x128xbf16>
    %19 = vector.shape_cast %18 : vector<64x128xbf16> to vector<1x8x8x128xbf16>
    %c0_27 = arith.constant 0 : index
    %c1 = arith.constant 1 : index
    %c1_28 = arith.constant 1 : index
    %c0_29 = arith.constant 0 : index
    %20 = vector.load %arg12[%c0_27, %c1, %c1_28, %c0_29] : memref<1x10x10x128xbf16, #tpu.memory_space<vmem>>, vector<1x8x8x128xbf16>
    tpu.vector_store %arg12[%c0_27, %c1, %c1_28, %c0_29], %19 {strides = array<i32>} : memref<1x10x10x128xbf16, #tpu.memory_space<vmem>>, vector<1x8x8x128xbf16>,
    %cst_30 = arith.constant 0.000000e+00 : f32
    %21 = vector.broadcast %cst_30 : f32 to vector<64x128xf32>
    %c0_31 = arith.constant 0 : index
    %c0_32 = arith.constant 0 : index
    %c0_33 = arith.constant 0 : index
    %c0_34 = arith.constant 0 : index
    %22 = vector.load %arg12[%c0_31, %c0_32, %c0_33, %c0_34] : memref<1x10x10x128xbf16, #tpu.memory_space<vmem>>, vector<1x8x8x128xbf16>
    %23 = vector.shape_cast %22 : vector<1x8x8x128xbf16> to vector<64x128xbf16>
    %c0_35 = arith.constant 0 : index
    %c0_36 = arith.constant 0 : index
    %c1_37 = arith.constant 1 : index
    %c0_38 = arith.constant 0 : index
    %24 = vector.load %arg12[%c0_35, %c0_36, %c1_37, %c0_38] : memref<1x10x10x128xbf16, #tpu.memory_space<vmem>>, vector<1x8x8x128xbf16>
    %25 = vector.shape_cast %24 : vector<1x8x8x128xbf16> to vector<64x128xbf16>
    %26 = tpu.concatenate %23, %25 in 1 : vector<64x128xbf16>, vector<64x128xbf16> -> vector<64x256xbf16>
    %c0_39 = arith.constant 0 : index
    %c0_40 = arith.constant 0 : index
    %27 = vector.load %arg5[%c0_39, %c0_40] : memref<1152x128xbf16, #tpu.memory_space<vmem>>, vector<256x128xbf16>
    %cst_41 = arith.constant dense<0.000000e+00> : vector<64x128xf32>
    %28 = tpu.matmul %26, %27, %cst_41 {dimension_numbers = #tpu.dot_dimension_numbers<[1], [0], [0], [1], [0, 0, 1, 1], [], []>} : vector<64x256xbf16>, vector<256x128xbf16>, vector<64x128xf32> -> vector<64x128xf32>
    %29 = arith.addf %21, %28 : vector<64x128xf32>
    %c0_42 = arith.constant 0 : index
    %c0_43 = arith.constant 0 : index
    %c2 = arith.constant 2 : index
    %c0_44 = arith.constant 0 : index
    %30 = vector.load %arg12[%c0_42, %c0_43, %c2, %c0_44] : memref<1x10x10x128xbf16, #tpu.memory_space<vmem>>, vector<1x8x8x128xbf16>
    %31 = vector.shape_cast %30 : vector<1x8x8x128xbf16> to vector<64x128xbf16>
    %c0_45 = arith.constant 0 : index
    %c1_46 = arith.constant 1 : index
    %c0_47 = arith.constant 0 : index
    %c0_48 = arith.constant 0 : index
    %32 = vector.load %arg12[%c0_45, %c1_46, %c0_47, %c0_48] : memref<1x10x10x128xbf16, #tpu.memory_space<vmem>>, vector<1x8x8x128xbf16>
    %33 = vector.shape_cast %32 : vector<1x8x8x128xbf16> to vector<64x128xbf16>
    %34 = tpu.concatenate %31, %33 in 1 : vector<64x128xbf16>, vector<64x128xbf16> -> vector<64x256xbf16>
    %c256 = arith.constant 256 : index
    %c0_49 = arith.constant 0 : index
    %35 = vector.load %arg5[%c256, %c0_49] : memref<1152x128xbf16, #tpu.memory_space<vmem>>, vector<256x128xbf16>
    %cst_50 = arith.constant dense<0.000000e+00> : vector<64x128xf32>
    %36 = tpu.matmul %34, %35, %cst_50 {dimension_numbers = #tpu.dot_dimension_numbers<[1], [0], [0], [1], [0, 0, 1, 1], [], []>} : vector<64x256xbf16>, vector<256x128xbf16>, vector<64x128xf32> -> vector<64x128xf32>
    %37 = arith.addf %29, %36 : vector<64x128xf32>
    %c0_51 = arith.constant 0 : index
    %c1_52 = arith.constant 1 : index
    %c1_53 = arith.constant 1 : index
    %c0_54 = arith.constant 0 : index
    %38 = vector.load %arg12[%c0_51, %c1_52, %c1_53, %c0_54] : memref<1x10x10x128xbf16, #tpu.memory_space<vmem>>, vector<1x8x8x128xbf16>
    %39 = vector.shape_cast %38 : vector<1x8x8x128xbf16> to vector<64x128xbf16>
    %c0_55 = arith.constant 0 : index
    %c1_56 = arith.constant 1 : index
    %c2_57 = arith.constant 2 : index
    %c0_58 = arith.constant 0 : index
    %40 = vector.load %arg12[%c0_55, %c1_56, %c2_57, %c0_58] : memref<1x10x10x128xbf16, #tpu.memory_space<vmem>>, vector<1x8x8x128xbf16>
    %41 = vector.shape_cast %40 : vector<1x8x8x128xbf16> to vector<64x128xbf16>
    %42 = tpu.concatenate %39, %41 in 1 : vector<64x128xbf16>, vector<64x128xbf16> -> vector<64x256xbf16>
    %c512 = arith.constant 512 : index
    %c0_59 = arith.constant 0 : index
    %43 = vector.load %arg5[%c512, %c0_59] : memref<1152x128xbf16, #tpu.memory_space<vmem>>, vector<256x128xbf16>
    %cst_60 = arith.constant dense<0.000000e+00> : vector<64x128xf32>
    %44 = tpu.matmul %42, %43, %cst_60 {dimension_numbers = #tpu.dot_dimension_numbers<[1], [0], [0], [1], [0, 0, 1, 1], [], []>} : vector<64x256xbf16>, vector<256x128xbf16>, vector<64x128xf32> -> vector<64x128xf32>
    %45 = arith.addf %37, %44 : vector<64x128xf32>
    %c0_61 = arith.constant 0 : index
    %c2_62 = arith.constant 2 : index
    %c0_63 = arith.constant 0 : index
    %c0_64 = arith.constant 0 : index
    %46 = vector.load %arg12[%c0_61, %c2_62, %c0_63, %c0_64] : memref<1x10x10x128xbf16, #tpu.memory_space<vmem>>, vector<1x8x8x128xbf16>
    %47 = vector.shape_cast %46 : vector<1x8x8x128xbf16> to vector<64x128xbf16>
    %c0_65 = arith.constant 0 : index
    %c2_66 = arith.constant 2 : index
    %c1_67 = arith.constant 1 : index
    %c0_68 = arith.constant 0 : index
    %48 = vector.load %arg12[%c0_65, %c2_66, %c1_67, %c0_68] : memref<1x10x10x128xbf16, #tpu.memory_space<vmem>>, vector<1x8x8x128xbf16>
    %49 = vector.shape_cast %48 : vector<1x8x8x128xbf16> to vector<64x128xbf16>
    %50 = tpu.concatenate %47, %49 in 1 : vector<64x128xbf16>, vector<64x128xbf16> -> vector<64x256xbf16>
    %c768 = arith.constant 768 : index
    %c0_69 = arith.constant 0 : index
    %51 = vector.load %arg5[%c768, %c0_69] : memref<1152x128xbf16, #tpu.memory_space<vmem>>, vector<256x128xbf16>
    %cst_70 = arith.constant dense<0.000000e+00> : vector<64x128xf32>
    %52 = tpu.matmul %50, %51, %cst_70 {dimension_numbers = #tpu.dot_dimension_numbers<[1], [0], [0], [1], [0, 0, 1, 1], [], []>} : vector<64x256xbf16>, vector<256x128xbf16>, vector<64x128xf32> -> vector<64x128xf32>
    %53 = arith.addf %45, %52 : vector<64x128xf32>
    %c0_71 = arith.constant 0 : index
    %c2_72 = arith.constant 2 : index
    %c2_73 = arith.constant 2 : index
    %c0_74 = arith.constant 0 : index
    %54 = vector.load %arg12[%c0_71, %c2_72, %c2_73, %c0_74] : memref<1x10x10x128xbf16, #tpu.memory_space<vmem>>, vector<1x8x8x128xbf16>
    %55 = vector.shape_cast %54 : vector<1x8x8x128xbf16> to vector<64x128xbf16>
    %c1024 = arith.constant 1024 : index
    %c0_75 = arith.constant 0 : index
    %56 = vector.load %arg5[%c1024, %c0_75] : memref<1152x128xbf16, #tpu.memory_space<vmem>>, vector<128x128xbf16>
    %cst_76 = arith.constant dense<0.000000e+00> : vector<64x128xf32>
    %57 = tpu.matmul %55, %56, %cst_76 {dimension_numbers = #tpu.dot_dimension_numbers<[1], [0], [0], [1], [0, 0, 1, 1], [], []>} : vector<64x128xbf16>, vector<128x128xbf16>, vector<64x128xf32> -> vector<64x128xf32>
    %58 = arith.addf %53, %57 : vector<64x128xf32>
    %c0_77 = arith.constant 0 : index
    %c0_78 = arith.constant 0 : index
    %59 = vector.load %arg6[%c0_77, %c0_78] : memref<1x128xf32, #tpu.memory_space<vmem>>, vector<1x128xf32>
    %60 = vector.broadcast %59 : vector<1x128xf32> to vector<64x128xf32>
    %61 = arith.mulf %58, %60 : vector<64x128xf32>
    %c0_79 = arith.constant 0 : index
    %c0_80 = arith.constant 0 : index
    %62 = vector.load %arg7[%c0_79, %c0_80] : memref<1x128xf32, #tpu.memory_space<vmem>>, vector<1x128xf32>
    %63 = vector.broadcast %62 : vector<1x128xf32> to vector<64x128xf32>
    %64 = arith.addf %61, %63 : vector<64x128xf32>
    %cst_81 = arith.constant 0.000000e+00 : f32
    %65 = vector.broadcast %cst_81 : f32 to vector<64x128xf32>
    %66 = arith.maximumf %64, %65 : vector<64x128xf32>
    %67 = arith.truncf %66 : vector<64x128xf32> to vector<64x128xbf16>
    %c0_82 = arith.constant 0 : index
    %c0_83 = arith.constant 0 : index
    %68 = vector.load %arg8[%c0_82, %c0_83] : memref<128x128xbf16, #tpu.memory_space<vmem>>, vector<128x128xbf16>
    %cst_84 = arith.constant dense<0.000000e+00> : vector<64x128xf32>
    %69 = tpu.matmul %67, %68, %cst_84 {dimension_numbers = #tpu.dot_dimension_numbers<[1], [0], [0], [1], [0, 0, 1, 1], [], []>} : vector<64x128xbf16>, vector<128x128xbf16>, vector<64x128xf32> -> vector<64x128xf32>
    %c0_85 = arith.constant 0 : index
    %c0_86 = arith.constant 0 : index
    %70 = vector.load %arg9[%c0_85, %c0_86] : memref<1x128xf32, #tpu.memory_space<vmem>>, vector<1x128xf32>
    %71 = vector.broadcast %70 : vector<1x128xf32> to vector<64x128xf32>
    %72 = arith.mulf %69, %71 : vector<64x128xf32>
    %c0_87 = arith.constant 0 : index
    %c0_88 = arith.constant 0 : index
    %73 = vector.load %arg10[%c0_87, %c0_88] : memref<1x128xf32, #tpu.memory_space<vmem>>, vector<1x128xf32>
    %74 = vector.broadcast %73 : vector<1x128xf32> to vector<64x128xf32>
    %75 = arith.addf %72, %74 : vector<64x128xf32>
    %76 = arith.extf %1 : vector<64x128xbf16> to vector<64x128xf32>
    %77 = arith.addf %75, %76 : vector<64x128xf32>
    %cst_89 = arith.constant 0.000000e+00 : f32
    %78 = vector.broadcast %cst_89 : f32 to vector<64x128xf32>
    %79 = arith.maximumf %77, %78 : vector<64x128xf32>
    %80 = vector.shape_cast %79 : vector<64x128xf32> to vector<1x8x8x128xf32>
    %81 = arith.truncf %80 : vector<1x8x8x128xf32> to vector<1x8x8x128xbf16>
    %c0_90 = arith.constant 0 : index
    %c0_91 = arith.constant 0 : index
    %c0_92 = arith.constant 0 : index
    %c0_93 = arith.constant 0 : index
    %82 = vector.load %arg11[%c0_90, %c0_91, %c0_92, %c0_93] : memref<1x8x8x128xbf16, #tpu.memory_space<vmem>>, vector<1x8x8x128xbf16>
    tpu.vector_store %arg11[%c0_90, %c0_91, %c0_92, %c0_93], %81 {strides = array<i32>} : memref<1x8x8x128xbf16, #tpu.memory_space<vmem>>, vector<1x8x8x128xbf16>,
    return
  }
  func.func @transform_0(%arg0: i32) -> (i32, i32, i32, i32) {
    %c0_i32 = arith.constant 0 : i32
    %c0_i32_0 = arith.constant 0 : i32
    %c0_i32_1 = arith.constant 0 : i32
    %c0_i32_2 = arith.constant 0 : i32
    return %arg0, %c0_i32, %c0_i32_0, %c0_i32_1 : i32, i32, i32, i32
  }
  func.func @transform_1(%arg0: i32) -> (i32, i32) {
    %c0_i32 = arith.constant 0 : i32
    %c0_i32_0 = arith.constant 0 : i32
    %c0_i32_1 = arith.constant 0 : i32
    return %c0_i32, %c0_i32_0 : i32, i32
  }
  func.func @transform_2(%arg0: i32) -> (i32, i32) {
    %c0_i32 = arith.constant 0 : i32
    %c0_i32_0 = arith.constant 0 : i32
    %c0_i32_1 = arith.constant 0 : i32
    return %c0_i32, %c0_i32_0 : i32, i32
  }
  func.func @transform_3(%arg0: i32) -> (i32, i32) {
    %c0_i32 = arith.constant 0 : i32
    %c0_i32_0 = arith.constant 0 : i32
    %c0_i32_1 = arith.constant 0 : i32
    return %c0_i32, %c0_i32_0 : i32, i32
  }
  func.func @transform_4(%arg0: i32) -> (i32, i32) {
    %c0_i32 = arith.constant 0 : i32
    %c0_i32_0 = arith.constant 0 : i32
    %c0_i32_1 = arith.constant 0 : i32
    return %c0_i32, %c0_i32_0 : i32, i32
  }
  func.func @transform_5(%arg0: i32) -> (i32, i32) {
    %c0_i32 = arith.constant 0 : i32
    %c0_i32_0 = arith.constant 0 : i32
    %c0_i32_1 = arith.constant 0 : i32
    return %c0_i32, %c0_i32_0 : i32, i32
  }
  func.func @transform_6(%arg0: i32) -> (i32, i32) {
    %c0_i32 = arith.constant 0 : i32
    %c0_i32_0 = arith.constant 0 : i32
    %c0_i32_1 = arith.constant 0 : i32
    return %c0_i32, %c0_i32_0 : i32, i32
  }
  func.func @transform_7(%arg0: i32) -> (i32, i32) {
    %c0_i32 = arith.constant 0 : i32
    %c0_i32_0 = arith.constant 0 : i32
    %c0_i32_1 = arith.constant 0 : i32
    return %c0_i32, %c0_i32_0 : i32, i32
  }
  func.func @transform_8(%arg0: i32) -> (i32, i32) {
    %c0_i32 = arith.constant 0 : i32
    %c0_i32_0 = arith.constant 0 : i32
    %c0_i32_1 = arith.constant 0 : i32
    return %c0_i32, %c0_i32_0 : i32, i32
  }
  func.func @transform_9(%arg0: i32) -> (i32, i32) {
    %c0_i32 = arith.constant 0 : i32
    %c0_i32_0 = arith.constant 0 : i32
    %c0_i32_1 = arith.constant 0 : i32
    return %c0_i32, %c0_i32_0 : i32, i32
  }
  func.func @transform_10(%arg0: i32) -> (i32, i32, i32, i32) {
    %c0_i32 = arith.constant 0 : i32
    %c0_i32_0 = arith.constant 0 : i32
    %c0_i32_1 = arith.constant 0 : i32
    %c0_i32_2 = arith.constant 0 : i32
    return %arg0, %c0_i32, %c0_i32_0, %c0_i32_1 : i32, i32, i32, i32
  }
}

</mosaic_0001>

<bundles_post_ra>
// kernel: bottleneck_pallas_nhwc.1
= control target key start
LH: loop header
LB: loop body
LE: loop exit
PB: predicated region body
PF: predicated region fallthrough
CT: control target
= control target key end

     0   :  { %15 = vsyncpa [#allocation4], 0  ;;  %s4404_s0 = inlined_call_operand.vmem [shape: bf16[2,8,8,128], index: 0, kind: input, shape index: {}]   ;;  %s4405_s1 = inlined_call_operand.vmem [shape: bf16[128,128], index: 1, kind: input, shape index: {}]   ;;  %s4406_s2 = inlined_call_operand.vmem [shape: f32[1,128], index: 2, kind: input, shape index: {}]   ;;  %s4407_s3 = inlined_call_operand.vmem [shape: f32[1,128], index: 3, kind: input, shape index: {}]   ;;  %s4408_s4 = inlined_call_operand.vmem [shape: bf16[1152,128], index: 4, kind: input, shape index: {}]   ;;  %s4409_s5 = inlined_call_operand.vmem [shape: f32[1,128], index: 5, kind: input, shape index: {}]   ;;  %s4410_s6 = inlined_call_operand.vmem [shape: f32[1,128], index: 6, kind: input, shape index: {}]   ;;  %s4411_s7 = inlined_call_operand.vmem [shape: bf16[128,128], index: 7, kind: input, shape index: {}]   ;;  %s4412_s8 = inlined_call_operand.vmem [shape: f32[1,128], index: 8, kind: input, shape index: {}]   ;;  %s4413_s9 = inlined_call_operand.vmem [shape: f32[1,128], index: 9, kind: input, shape index: {}]   ;;  %s4414_s10 = inlined_call_operand.hbm [shape: bf16[2,8,8,128], index: 10, kind: output, shape index: {}]  }
   0x1   :  { %17 = vsyncpa [#allocation4 + $0x1], 0  ;;  %s3532_s13 = smov 0   ;;  %s3534_s14 = smov 0  }
   0x2   :  { %s3536_s15 = smov 0   ;;  %s3538_s16 = smov 0  }
   0x3 LB: > { %s3553_s17 = sadd.s32 4294967295, %s3471_s16   ;;  %s2760_s18 = sadd.s32 4294967294, %s3471_s16   ;;  %s3471_s16 = sphi %s3538_s16, %s4446_s16   ;;  %s3467_s15 = sphi %s3536_s15, %s4445_s15   ;;  %s3463_s14 = sphi %s3534_s14, %s4444_s14   ;;  %s3459_s13 = sphi %s3532_s13, %s4443_s13  }
   0x4   : > { %s3557_s19 = sadd.s32 1, %s3471_s16   ;;  %s245_s20 = sadd.s32 1, %s3467_s15 }
   0x5   : > { %s242_s21 = ssub.s32 %s3471_s16, %s3557_s19  ;;  %p255_p0 = scmp.ne.s32.totalorder %s3467_s15, %s3463_s14 }
   0x6   : > { %p243_p1 = scmp.eq.s32.totalorder %s242_s21, 0  ;;  %p256_p2 = scmp.eq.s32.totalorder %s3553_s17, 1 }
   0x7   : > { %p261_p3 = scmp.ne.s32.totalorder %s3463_s14, %s3459_s13  ;;  %p262_p4 = scmp.eq.s32.totalorder %s2760_s18, 1 }
   0x8   : > { %s3568_s22 = scalar_select %p243_p1, %s3467_s15, %s245_s20  }
   0x9   : > { %p3570_p5 = por %p256_p2, %p255_p0  ;;  %p3574_p6 = por %p262_p4, %p261_p3 }
   0xa   : > { %p2763_p7 = scmp.ge.s32.totalorder %s3471_s16, 1  ;;  %p315_p8 = scmp.lt.s32.totalorder %s3471_s16, 3 }
   0xc   : > { %p316_p9 = pnand %p2763_p7, %p315_p8 }
   0xe   : > { %319 = sbr.rel (%p316_p9) target bundleno = 798 (0x31e), region = 60 }
  0x13   : > { %v3297_v0 = vld [vmem:[%s4405_s1 + $0x38] sm:$0xff]   ;;  %p353_p10 = scmp.lt.s32.totalorder %s3553_s17, 1  ;;  %v3298_v1 = vld [vmem:[%s4405_s1 + $0x30] sm:$0xff]   ;;  %v3299_v2 = vld [vmem:[%s4405_s1 + $0x28] sm:$0xff]   ;;  %vm563_vm0 = vcmask 1040384   ;;  %v3473_v40 = vmov 0  }
  0x14   : > { %3167 = vmatprep.subr.bf16.mxu0 %v3297_v0  ;;  %v3300_v3 = vld [vmem:[%s4405_s1 + $0x20] sm:$0xff]   ;;  %v3301_v5 = vld [vmem:[%s4405_s1 + $0x18] sm:$0xff]   ;;  %v3302_v6 = vld [vmem:[%s4405_s1 + $0x10] sm:$0xff]   ;;  %vm564_vm1 = vsmask.f32 256  ;;  %vm1010_vm5 = vcmask 1042432  }
  0x15   : > { %s354_s29 = scalar_select %p353_p10, %s3553_s17, 1  ;;  %3168 = vmatpush3.bf16.msra.mxu0 %v3297_v0  ;;  %v3303_v7 = vld [vmem:[%s4405_s1 + $0x8] sm:$0xff]   ;;  %v3304_v8 = vld [vmem:[%s4405_s1] sm:$0xff]   ;;  %v3309_v12 = vld [vmem:[%s4408_s4 + $0xf8] sm:$0xff]   ;;  %vm596_vm2 = vsmask.f32 7938 }
  0x16   : > { %3169 = vmatprep.subr.bf16.mxu0 %v3298_v1  ;;  %v3310_v13 = vld [vmem:[%s4408_s4 + $0xb8] sm:$0xff]   ;;  %2983 = vmatprep.subr.bf16.mxu1 %v3309_v12  ;;  %v3311_v14 = vld [vmem:[%s4408_s4 + $0xf0] sm:$0xff]   ;;  %vm3627_vm3 = vmand %vm563_vm0, %vm564_vm1  ;;  %558 = vst [vmem:[#allocation2] sm:$0xf] %v3473_v40  ;;  %vm1011_vm6 = vcmask 1046532   ;;  %vm733_vm7 = vcmask 1043456  }
  0x17   : > { %s2938_s12 = sshll.u32 %s354_s29, 5  ;;  %2984 = vmatpush3.bf16.msra.mxu1 %v3310_v13  ;;  %v3312_v15 = vld [vmem:[%s4408_s4 + $0xb0] sm:$0xff]   ;;  %v575_v17 = vld [vmem:[#allocation2 + $0x18] sm:$0x1]  ;;  %v607_v18 = vld [vmem:[#allocation2 + $0x1c] sm:$0x1] }
  0x18   : > { %s3594_s21 = scalar_lea.vmem %s4404_s0, %s2938_s12  ;;  %2985 = vmatprep.subr.bf16.mxu1 %v3311_v14  ;;  %v576_v19 = vsel %vm3627_vm3, 0, %v575_v17  ;;  %vm3634_vm4 = vmand %vm563_vm0, %vm596_vm2  ;;  %v3313_v21 = vld [vmem:[%s4408_s4 + $0x78] sm:$0xff]   ;;  %v569_v24 = vld [vmem:[#allocation2 + $0x8] sm:$0x1]  ;;  %559 = vst [vmem:[#allocation2 + $0x4] sm:$0x1] %v3473_v40 }
  0x19   : > { %3170 = vmatpush3.bf16.msra.mxu0 %v3298_v1  ;;  %v359_v4 = vld [vmem:[%s3594_s21] sm:$0xff]   ;;  %v361_v9 = vld [vmem:[%s3594_s21 + $0x8] sm:$0xff]   ;;  %v363_v10 = vld [vmem:[%s3594_s21 + $0x10] sm:$0xff]   ;;  %577 = vst [vmem:[#allocation2 + $0x18] sm:$0x1] %v576_v19  ;;  %v608_v23 = vsel %vm3634_vm4, 0, %v607_v18 }
  0x1a   : > { %3171 = vmatprep.subr.bf16.mxu0 %v3299_v2  ;;  %3183 = vmatprep.mubr.bf16.mxu0 %v359_v4  ;;  %v365_v11 = vld [vmem:[%s3594_s21 + $0x18] sm:$0xff]   ;;  %v601_v25 = vld [vmem:[#allocation2 + $0xc] sm:$0x1]  ;;  %609 = vst [vmem:[#allocation2 + $0x1c] sm:$0x1] %v608_v23  ;;  %v570_v27 = vsel %vm3627_vm3, 0, %v569_v24  ;;  %vm3802_vm8 = vmor %vm1010_vm5, %vm1011_vm6 }
  0x1b   : > { %2986 = vmatpush3.bf16.msra.mxu1 %v3312_v15  ;;  %v3314_v22 = vld [vmem:[%s4408_s4 + $0x38] sm:$0xff]   ;;  %v3315_v26 = vld [vmem:[%s4408_s4 + $0xe8] sm:$0xff]   ;;  %v602_v28 = vsel %vm3634_vm4, 0, %v601_v25  ;;  %571 = vst [vmem:[#allocation2 + $0x8] sm:$0x1] %v570_v27  ;;  %v3317_v34 = vld [vmem:[%s4408_s4 + $0x70] sm:$0xff]  }
  0x1c   : > { %v3316_v29 = vld [vmem:[%s4408_s4 + $0xa8] sm:$0xff]   ;;  %603 = vst [vmem:[#allocation2 + $0xc] sm:$0x1] %v602_v28  ;;  %v578_v30 = vld [vmem:[#allocation2 + $0x20] sm:$0x1]  ;;  %2987 = vmatprep.subr.bf16.mxu1 %v3315_v26  ;;  %v3318_v35 = vld [vmem:[%s4408_s4 + $0x30] sm:$0xff]  }
  0x1d   : > { %3172 = vmatpush3.bf16.msra.mxu0 %v3299_v2  ;;  %v610_v31 = vld [vmem:[#allocation2 + $0x24] sm:$0x1]  ;;  %v579_v32 = vsel %vm3627_vm3, 0, %v578_v30  ;;  %v572_v36 = vld [vmem:[#allocation2 + $0x10] sm:$0x1]  ;;  %v3321_v45 = vld [vmem:[%s4408_s4 + $0x68] sm:$0xff]  }
  0x1e   : > { %3173 = vmatprep.subr.bf16.mxu0 %v3300_v3  ;;  %v611_v33 = vsel %vm3634_vm4, 0, %v610_v31  ;;  %580 = vst [vmem:[#allocation2 + $0x20] sm:$0x1] %v579_v32  ;;  %v604_v37 = vld [vmem:[#allocation2 + $0x14] sm:$0x1]  ;;  %v573_v38 = vsel %vm3627_vm3, 0, %v572_v36  ;;  %vm3817_vm9 = vmand %vm733_vm7, %vm596_vm2 }
  0x1f   : > { %2988 = vmatpush3.bf16.msra.mxu1 %v3316_v29  ;;  %612 = vst [vmem:[#allocation2 + $0x24] sm:$0x1] %v611_v33  ;;  %v605_v39 = vsel %vm3634_vm4, 0, %v604_v37  ;;  %574 = vst [vmem:[#allocation2 + $0x10] sm:$0x1] %v573_v38  ;;  %v3319_v41 = vld [vmem:[%s4408_s4 + $0xe0] sm:$0xff]  }
  0x20   : > { %606 = vst [vmem:[#allocation2 + $0x14] sm:$0x1] %v605_v39  ;;  %561 = vst [vmem:[#allocation2 + $0x48] sm:$0xf] %v3473_v40  ;;  %v3320_v42 = vld [vmem:[%s4408_s4 + $0xa0] sm:$0xff]   ;;  %2989 = vmatprep.subr.bf16.mxu1 %v3319_v41  ;;  %v3322_v50 = vld [vmem:[%s4408_s4 + $0x28] sm:$0xff]  }
  0x21   : > { %3174 = vmatpush3.bf16.msra.mxu0 %v3300_v3  ;;  %562 = vst [vmem:[#allocation2 + $0x4c] sm:$0x1] %v3473_v40  ;;  %v581_v43 = vld [vmem:[#allocation2 + $0x28] sm:$0x1]  ;;  %v613_v44 = vld [vmem:[#allocation2 + $0x2c] sm:$0x1] }
  0x22   : > { %3175 = vmatprep.subr.bf16.mxu0 %v3301_v5  ;;  %v587_v46 = vld [vmem:[#allocation2 + $0x38] sm:$0x1]  ;;  %v582_v47 = vsel %vm3627_vm3, 0, %v581_v43  ;;  %v614_v48 = vsel %vm3634_vm4, 0, %v613_v44  ;;  %v619_v52 = vld [vmem:[#allocation2 + $0x3c] sm:$0x1] }
  0x23   : > { %2990 = vmatpush3.bf16.msra.mxu1 %v3320_v42  ;;  %v588_v49 = vsel %vm3627_vm3, 0, %v587_v46  ;;  %583 = vst [vmem:[#allocation2 + $0x28] sm:$0x1] %v582_v47  ;;  %615 = vst [vmem:[#allocation2 + $0x2c] sm:$0x1] %v614_v48  ;;  %v3323_v51 = vld [vmem:[%s4408_s4 + $0xd8] sm:$0xff]  }
  0x24   : > { %589 = vst [vmem:[#allocation2 + $0x38] sm:$0x1] %v588_v49  ;;  %v3324_v53 = vld [vmem:[%s4408_s4 + $0x98] sm:$0xff]   ;;  %v620_v54 = vsel %vm3634_vm4, 0, %v619_v52  ;;  %2991 = vmatprep.subr.bf16.mxu1 %v3323_v51  ;;  %v3325_v55 = vld [vmem:[%s4408_s4 + $0x60] sm:$0xff]   ;;  %v3327_v61 = vld [vmem:[%s4408_s4 + $0xd0] sm:$0xff]  }
  0x25   : > { %3176 = vmatpush3.bf16.msra.mxu0 %v3301_v5  ;;  %621 = vst [vmem:[#allocation2 + $0x3c] sm:$0x1] %v620_v54  ;;  %v590_v56 = vld [vmem:[#allocation2 + $0x40] sm:$0x1]  ;;  %v622_v60 = vld [vmem:[#allocation2 + $0x44] sm:$0x1] }
  0x26   : > { %3177 = vmatprep.subr.bf16.mxu0 %v3302_v6  ;;  %v3326_v57 = vld [vmem:[%s4408_s4 + $0x20] sm:$0xff]   ;;  %v591_v59 = vsel %vm3627_vm3, 0, %v590_v56  ;;  %v623_v63 = vsel %vm3634_vm4, 0, %v622_v60  ;;  %v584_v0 = vld [vmem:[#allocation2 + $0x30] sm:$0x1]  ;;  %v3329_v5 = vld [vmem:[%s4408_s4 + $0x58] sm:$0xff]  }
  0x27   : > { %2992 = vmatpush3.bf16.msra.mxu1 %v3324_v53  ;;  %v566_v58 = vld [vmem:[#allocation2] sm:$0x1]  ;;  %592 = vst [vmem:[#allocation2 + $0x40] sm:$0x1] %v591_v59  ;;  %v616_v1 = vld [vmem:[#allocation2 + $0x34] sm:$0x1] }
  0x28   : > { %v567_v62 = vsel %vm3627_vm3, 0, %v566_v58  ;;  %v3328_v2 = vld [vmem:[%s4408_s4 + $0x90] sm:$0xff]   ;;  %624 = vst [vmem:[#allocation2 + $0x44] sm:$0x1] %v623_v63  ;;  %v585_v3 = vsel %vm3627_vm3, 0, %v584_v0  ;;  %v617_v4 = vsel %vm3634_vm4, 0, %v616_v1  ;;  %2993 = vmatprep.subr.bf16.mxu1 %v3327_v61 }
  0x29   : > { %3178 = vmatpush3.bf16.msra.mxu0 %v3302_v6  ;;  %568 = vst [vmem:[#allocation2] sm:$0x1] %v567_v62  ;;  %v598_v6 = vld [vmem:[#allocation2 + $0x4] sm:$0x1]  ;;  %586 = vst [vmem:[#allocation2 + $0x30] sm:$0x1] %v585_v3 }
  0x2a   : > { %3179 = vmatprep.subr.bf16.mxu0 %v3303_v7  ;;  %618 = vst [vmem:[#allocation2 + $0x34] sm:$0x1] %v617_v4  ;;  %v3334_v12 = vld [vmem:[%s4408_s4 + $0x10] sm:$0xff]   ;;  %v3335_v13 = vld [vmem:[%s4408_s4 + $0xc0] sm:$0xff]   ;;  %v3337_v15 = vld [vmem:[%s4408_s4 + $0x48] sm:$0xff]   ;;  %s350_s27 = sand.u32 1, %s3463_s14  }
  0x2b   : > { %2994 = vmatpush3.bf16.msra.mxu1 %v3328_v2  ;;  %v3336_v14 = vld [vmem:[%s4408_s4 + $0x80] sm:$0xff]   ;;  %v3338_v17 = vld [vmem:[%s4408_s4 + $0x8] sm:$0xff]   ;;  %v3340_v18 = vld [vmem:[%s4408_s4 + $0x178] sm:$0xff]   ;;  %vm799_vm10 = vsmask.f32 3328  ;;  %s2764_s28 = sshll.u32 %s350_s27, 5 }
  0x2c   : > { %v3343_v19 = vld [vmem:[%s4408_s4 + $0x40] sm:$0xff]   ;;  %v593_v23 = vld [vmem:[#allocation2 + $0x48] sm:$0x1]  ;;  %v625_v25 = vld [vmem:[#allocation2 + $0x4c] sm:$0x1]  ;;  %s352_s29 = scalar_lea.vmem [#allocation3], %s2764_s28 }
  0x2d   : > { %3180 = vmatpush3.bf16.msra.mxu0 %v3303_v7  ;;  %v3330_v7 = vld [vmem:[%s4408_s4 + $0x18] sm:$0xff]   ;;  %v594_v24 = vsel %vm3627_vm3, 0, %v593_v23  ;;  %v626_v26 = vsel %vm3634_vm4, 0, %v625_v25  ;;  %v3771_v28 = vld [vmem:[%s4406_s2] ss:$0 sm:$0xff]  ;;  %v3350_v16 = vld [vmem:[%s4408_s4 + $0x168] sm:$0xff]  }
  0x2e   : > { %3181 = vmatprep.subr.bf16.mxu0 %v3304_v8  ;;  %595 = vst [vmem:[#allocation2 + $0x48] sm:$0x1] %v594_v24  ;;  %627 = vst [vmem:[#allocation2 + $0x4c] sm:$0x1] %v626_v26  ;;  %v3776_v31 = vld [vmem:[%s4407_s3] ss:$0 sm:$0xff] }
  0x2f   : > { %v986_v40 = vld [vmem:[#allocation2] sm:$0xe]  ;;  %v738_v23 = vld [vmem:[#allocation2 + $0xc] sm:$0x1]  ;;  %vm800_vm11 = vsmask.f32 7440 }
  0x30   : > { %v3766_v27 = vld [vmem:[#allocation2] sm:$0xf]  ;;  %v2797_v48 = vrot.slane %v986_v40, 9  ;;  %vm3887_vm12 = vmor %vm799_vm10, %vm800_vm11  ;;  %v3395_v61 = vld [vmem:[%s4411_s7 + $0x28] sm:$0xff]   ;;  %s2698_s30 = sshll.u32 %s352_s29, 4  ;;  %s3474_s25 = smov [#allocation3]   ;;  %s4360_s30 = int_to_ptr.vmem [resolvable:$true] %s2698_s30 }
  0x31   : > { %3182 = vmatpush3.bf16.msra.mxu0 %v3304_v8  ;;  %v599_v8 = vsel %vm3634_vm4, 0, %v598_v6  ;;  %v803_v32 = vshrl.u32 %v3766_v27, 16  ;;  %v806_v20 = vshll.u32 %v3766_v27, 16  ;;  %s3411_s20 = scalar_lea.vmem %s4360_s30, 512  ;;  %s3415_s26 = sshll.u32 %s3474_s25, 4  ;;  %s3416_s26 = int_to_ptr.vmem [resolvable:$false] %s3415_s26 }
  0x32   : > { %3023 = vmatprep.subr.bf16.mxu0 %v3313_v21  ;;  %600 = vst [vmem:[#allocation2 + $0x4] sm:$0x1] %v599_v8  ;;  %v3344_v21 = vld [vmem:[%s4408_s4] sm:$0xff]   ;;  %p3412_p11 = scmp.ne.s32.totalorder %s4360_s30, %s3411_s20  ;;  %s3417_s28 = scalar_lea.vmem %s3416_s26, 1024 }
  0x33   : > { %v3785_v42 = vrot.slane %v803_v32, 4  ;;  %v3787_v43 = vrot.slane %v806_v20, 5  ;;  %p3418_p0 = scmp.lt.s32.totalorder %s4360_s30, %s3416_s26  ;;  %p3419_p1 = scmp.lt.s32.totalorder %s3417_s28, %s3411_s20 }
  0x34   : > { %3184 = vmatmul.mubr.bf16.vlgmr.msra.gmra.mxu0 %v361_v9  ;;  %v3331_v9 = vld [vmem:[%s4408_s4 + $0xc8] sm:$0xff]   ;;  %p3413_p12 = pnand %p3412_p11, %p3570_p5 }
  0x35   : > { %3187 = vmatprep.mubr.bf16.mxu0 %v363_v10  ;;  %3024 = vmatpush3.bf16.msra.mxu0 %v3314_v22  ;;  %v3332_v10 = vld [vmem:[%s4408_s4 + $0x88] sm:$0xff]   ;;  %v3348_v22 = vld [vmem:[%s4408_s4 + $0x1f8] sm:$0xff]   ;;  %p3420_p2 = por %p3419_p1, %p3418_p0 }
  0x36   : > { %3025 = vmatprep.subr.bf16.mxu0 %v3317_v34  ;;  %2995 = vmatprep.subr.bf16.mxu1 %v3331_v9  ;;  %v1872_v29 = vld [vmem:[#allocation2 + $0x48] sm:$0xf]  ;;  %v747_v9 = vld [vmem:[#allocation2 + $0x18] sm:$0xf]  ;;  %p3414_p13 = pneg %p3413_p12 }
  0x37   : > { %2996 = vmatpush3.bf16.msra.mxu1 %v3332_v10  ;;  %v1983_v36 = vshll.u32 %v1872_v29, 16  ;;  %v750_v10 = vld [vmem:[#allocation2 + $0x1c] sm:$0x1] }
  0x38   : > { %2997 = vmatprep.subr.bf16.mxu1 %v3335_v13  ;;  %p3421_p3 = pnand %p3420_p2, %p3414_p13 }
  0x39   : > { %3026 = vmatpush3.bf16.msra.mxu0 %v3318_v35  ;;  %v1980_v35 = vshrl.u32 %v1872_v29, 16  ;;  %v3783_v39 = vld [vmem:[#allocation2 + $0x4] sm:$0x1]  ;;  %v3794_v51 = vrot.slane %v1983_v36, 5 }
  0x3a   : > { %3027 = vmatprep.subr.bf16.mxu0 %v3321_v45  ;;  %v1015_v49 = vrot.slane %v3783_v39, 5  ;;  %v812_v62 = vshll.u32 %v3783_v39, 16 }
  0x3b   : > { %2998 = vmatpush3.bf16.msra.mxu1 %v3336_v14 }
  0x3c   : > { %3188 = vmatmul.mubr.bf16.gmra.mxu0 %v365_v11  ;;  %v3333_v11 = vld [vmem:[%s4408_s4 + $0x50] sm:$0xff]   ;;  %3063 = vmatprep.subr.bf16.mxu1 %v3340_v18  ;;  %v3811_v2 = vsel %vm3802_vm8, %v2797_v48, %v1015_v49 }
  0x3d   : > { %3028 = vmatpush3.bf16.msra.mxu0 %v3322_v50  ;;  %v3792_v50 = vrot.slane %v1980_v35, 4 }
  0x3e   : > { %3029 = vmatprep.subr.bf16.mxu0 %v3325_v55 }
  0x3f   : > { %v1986_v3 = vor.u32 %v3794_v51, %v3792_v50 }
  0x41   : > { %3030 = vmatpush3.bf16.msra.mxu0 %v3326_v57  ;;  %v809_v57 = vor.u32 %v3787_v43, %v3785_v42 }
  0x42   : > { %3031 = vmatprep.subr.bf16.mxu0 %v3329_v5 }
  0x45   : > { %3032 = vmatpush3.bf16.msra.mxu0 %v3330_v7 }
  0x46   : > { %3033 = vmatprep.subr.bf16.mxu0 %v3333_v11 }
  0x49   : > { %3034 = vmatpush3.bf16.msra.mxu0 %v3334_v12 }
  0x4a   : > { %3035 = vmatprep.subr.bf16.mxu0 %v3337_v15 }
  0x4d   : > { %3036 = vmatpush3.bf16.msra.mxu0 %v3338_v17 }
  0x4e   : > { %3037 = vmatprep.subr.bf16.mxu0 %v3343_v19 }
  0x51   : > { %3038 = vmatpush3.bf16.msra.mxu0 %v3344_v21 }
  0x52   : > { %3103 = vmatprep.subr.bf16.mxu0 %v3348_v22  ;;  %v735_v22 = vld [vmem:[#allocation2 + $0x8] sm:$0xf] }
  0xf4   : > { %v3185_v30 = vpop.f32.mrf.mxu0 }
  0xf5   : > { %v529_v33 = vmul.f32 %v3185_v30, %v3771_v28 }
  0xf6   : > { %v489_v34 = vpop.f32.mrf.mxu0 }
  0xf7   : > { %v544_v37 = vadd.f32 %v3776_v31, %v529_v33  ;;  %v527_v38 = vmul.f32 %v3771_v28, %v489_v34 }
  0xf8   : > { %v3186_v41 = vpop.f32.mrf.mxu0 }
  0xf9   : > { %v552_v44 = vmax.f32 %v544_v37, 0.0  ;;  %v542_v45 = vadd.f32 %v3776_v31, %v527_v38  ;;  %v530_v46 = vmul.f32 %v3186_v41, %v3771_v28 }
  0xfa   : > { %v492_v47 = vpop.f32.mrf.mxu0 }
  0xfb   : > { %v2941_v52 = vpack.c.bf16 %v552_v44, %v552_v44  ;;  %v550_v53 = vmax.f32 %v542_v45, 0.0  ;;  %v545_v54 = vadd.f32 %v3776_v31, %v530_v46  ;;  %v528_v55 = vmul.f32 %v3771_v28, %v492_v47  ;;  %v753_v44 = vld [vmem:[#allocation2 + $0x20] sm:$0xf]  ;;  %v756_v45 = vld [vmem:[#allocation2 + $0x24] sm:$0x1] }
  0xfc   : > { %v3189_v56 = vpop.f32.mrf.mxu0 }
  0xfd   : > { %v669_v58 = vshrl.u32 %v2941_v52, 16  ;;  %v2939_v59 = vpack.c.bf16 %v550_v53, %v550_v53  ;;  %v553_v60 = vmax.f32 %v545_v54, 0.0  ;;  %v543_v63 = vadd.f32 %v3776_v31, %v528_v55  ;;  %v741_v54 = vld [vmem:[#allocation2 + $0x10] sm:$0xf]  ;;  %v744_v55 = vld [vmem:[#allocation2 + $0x14] sm:$0x1] }
  0xfe   : > { %v533_v0 = vmul.f32 %v3189_v56, %v3771_v28  ;;  %v505_v1 = vpop.f32.mrf.mxu0  ;;  %v672_v5 = vshll.u32 %v2941_v52, 16 }
  0xff   : > { %v671_v4 = vrot.slane %v669_v58, 7  ;;  %v653_v6 = vshrl.u32 %v2939_v59, 16  ;;  %v2942_v7 = vpack.c.bf16 %v553_v60, %v553_v60  ;;  %v656_v11 = vshll.u32 %v2939_v59, 16 }
 0x100   : > { %v551_v12 = vmax.f32 %v543_v63, 0.0  ;;  %v548_v13 = vadd.f32 %v3776_v31, %v533_v0  ;;  %v531_v14 = vmul.f32 %v3771_v28, %v505_v1  ;;  %v3190_v15 = vpop.f32.mrf.mxu0 }
 0x101   : > { %v674_v17 = vor.u32 %v672_v5, %v671_v4  ;;  %v675_v18 = vrot.slane %v671_v4, 4  ;;  %v655_v19 = vrot.slane %v653_v6, 7  ;;  %v677_v21 = vshrl.u32 %v2942_v7, 16 }
 0x102   : > { %v680_v24 = vshll.u32 %v2942_v7, 16  ;;  %v2940_v25 = vpack.c.bf16 %v551_v12, %v551_v12  ;;  %v556_v26 = vmax.f32 %v548_v13, 0.0  ;;  %v546_v29 = vadd.f32 %v3776_v31, %v531_v14  ;;  %v508_v38 = vpop.f32.mrf.mxu0  ;;  %v774_v12 = vld [vmem:[#allocation2 + $0x3c] sm:$0x1]  ;;  %v759_v13 = vld [vmem:[#allocation2 + $0x28] sm:$0xf] }
 0x103   : > { %v748_v30 = vsel %vm3817_vm9, %v674_v17, %v747_v9  ;;  %v751_v32 = vsel %vm3627_vm3, %v675_v18, %v750_v10  ;;  %v658_v20 = vor.u32 %v656_v11, %v655_v19  ;;  %v659_v33 = vrot.slane %v655_v19, 4  ;;  %v771_v11 = vld [vmem:[#allocation2 + $0x38] sm:$0xf]  ;;  %v762_v14 = vld [vmem:[#allocation2 + $0x2c] sm:$0x1] }
 0x104   : > { %749 = vst [vmem:[#allocation2 + $0x18] sm:$0xf] %v748_v30  ;;  %752 = vst [vmem:[#allocation2 + $0x1c] sm:$0x1] %v751_v32  ;;  %v679_v34 = vrot.slane %v677_v21, 7  ;;  %v661_v35 = vshrl.u32 %v2940_v25, 16  ;;  %v2945_v37 = vpack.c.bf16 %v556_v26, %v556_v26  ;;  %v534_v47 = vmul.f32 %v3190_v15, %v3771_v28 }
 0x105   : > { %v664_v36 = vshll.u32 %v2940_v25, 16  ;;  %v736_v40 = vsel %vm3817_vm9, %v658_v20, %v735_v22  ;;  %v739_v41 = vsel %vm3627_vm3, %v659_v33, %v738_v23  ;;  %v554_v46 = vmax.f32 %v546_v29, 0.0  ;;  %v3849_v23 = vld [vmem:[#allocation2 + $0x4c] sm:$0x1] }
 0x106   : > { %737 = vst [vmem:[#allocation2 + $0x8] sm:$0xf] %v736_v40  ;;  %740 = vst [vmem:[#allocation2 + $0xc] sm:$0x1] %v739_v41  ;;  %v682_v48 = vor.u32 %v680_v24, %v679_v34  ;;  %v683_v49 = vrot.slane %v679_v34, 4  ;;  %v663_v52 = vrot.slane %v661_v35, 7  ;;  %v549_v59 = vadd.f32 %v3776_v31, %v534_v47 }
 0x107   : > { %v701_v53 = vshrl.u32 %v2945_v37, 16  ;;  %v704_v56 = vshll.u32 %v2945_v37, 16  ;;  %v2943_v58 = vpack.c.bf16 %v554_v46, %v554_v46  ;;  %v532_v60 = vmul.f32 %v3771_v28, %v508_v38  ;;  %v777_v34 = vld [vmem:[#allocation2 + $0x40] sm:$0xf]  ;;  %v780_v35 = vld [vmem:[#allocation2 + $0x44] sm:$0x1] }
 0x108   : > { %v754_v63 = vsel %vm3817_vm9, %v682_v48, %v753_v44  ;;  %v757_v0 = vsel %vm3627_vm3, %v683_v49, %v756_v45  ;;  %v666_v1 = vor.u32 %v664_v36, %v663_v52  ;;  %v667_v4 = vrot.slane %v663_v52, 4  ;;  %v3341_v45 = vld [vmem:[%s4408_s4 + $0x138] sm:$0xff]   ;;  %v765_v47 = vld [vmem:[#allocation2 + $0x30] sm:$0xf]  ;;  %v768_v48 = vld [vmem:[#allocation2 + $0x34] sm:$0x1] }
 0x109   : > { %755 = vst [vmem:[#allocation2 + $0x20] sm:$0xf] %v754_v63  ;;  %758 = vst [vmem:[#allocation2 + $0x24] sm:$0x1] %v757_v0  ;;  %v703_v5 = vrot.slane %v701_v53, 7  ;;  %v685_v6 = vshrl.u32 %v2943_v58, 16  ;;  %v547_v15 = vadd.f32 %v3776_v31, %v532_v60 }
 0x10a   : > { %v688_v7 = vshll.u32 %v2943_v58, 16  ;;  %v557_v9 = vmax.f32 %v549_v59, 0.0  ;;  %v742_v10 = vsel %vm3817_vm9, %v666_v1, %v741_v54  ;;  %v745_v28 = vsel %vm3627_vm3, %v667_v4, %v744_v55  ;;  %v3345_v52 = vld [vmem:[%s4408_s4 + $0x170] sm:$0xff]  }
 0x10b   : > { %v3847_v17 = vrot.slane %v809_v57, 4  ;;  %743 = vst [vmem:[#allocation2 + $0x10] sm:$0xf] %v742_v10  ;;  %746 = vst [vmem:[#allocation2 + $0x14] sm:$0x1] %v745_v28  ;;  %v706_v18 = vor.u32 %v704_v56, %v703_v5  ;;  %v707_v19 = vrot.slane %v703_v5, 4 }
 0x10c   : > { %v687_v21 = vrot.slane %v685_v6, 7  ;;  %v2946_v22 = vpack.c.bf16 %v557_v9, %v557_v9  ;;  %v555_v24 = vmax.f32 %v547_v15, 0.0  ;;  %v3853_v25 = vrot.slane %v812_v62, 5  ;;  %v3855_v26 = vld [vmem:[#allocation2 + $0x1c] sm:$0x1] }
 0x10d   : > { %v3860_v31 = vrot.slane %v1986_v3, 4  ;;  %v1989_v42 = vshll.u32 %v3849_v23, 16  ;;  %v772_v43 = vsel %vm3817_vm9, %v706_v18, %v771_v11  ;;  %v775_v57 = vsel %vm3627_vm3, %v707_v19, %v774_v12  ;;  %v792_v39 = vld [vmem:[#allocation2 + $0xc] sm:$0x1]  ;;  %v987_v33 = vld [vmem:[#allocation2 + $0x8] sm:$0xe] }
 0x10e   : > { %v690_v29 = vor.u32 %v688_v7, %v687_v21  ;;  %v691_v30 = vrot.slane %v687_v21, 4  ;;  %773 = vst [vmem:[#allocation2 + $0x38] sm:$0xf] %v772_v43  ;;  %776 = vst [vmem:[#allocation2 + $0x3c] sm:$0x1] %v775_v57  ;;  %v709_v62 = vshrl.u32 %v2946_v22, 16  ;;  %v2944_v20 = vpack.c.bf16 %v555_v24, %v555_v24 }
 0x10f   : > { %v712_v32 = vshll.u32 %v2946_v22, 16  ;;  %v1019_v50 = vrot.slane %v792_v39, 5  ;;  %v2798_v36 = vrot.slane %v987_v33, 9  ;;  %v3871_v37 = vld [vmem:[#allocation2 + $0x8] sm:$0xf]  ;;  %v826_v38 = vshll.u32 %v792_v39, 16 }
 0x110   : > { %v760_v51 = vsel %vm3817_vm9, %v690_v29, %v759_v13  ;;  %v763_v3 = vsel %vm3627_vm3, %v691_v30, %v762_v14  ;;  %v711_v40 = vrot.slane %v709_v62, 7  ;;  %v693_v41 = vshrl.u32 %v2944_v20, 16  ;;  %v989_v55 = vld [vmem:[#allocation2 + $0x18] sm:$0xe]  ;;  %v3346_v24 = vld [vmem:[%s4408_s4 + $0x130] sm:$0xff]  }
 0x111   : > { %761 = vst [vmem:[#allocation2 + $0x28] sm:$0xf] %v760_v51  ;;  %764 = vst [vmem:[#allocation2 + $0x2c] sm:$0x1] %v763_v3  ;;  %v696_v44 = vshll.u32 %v2944_v20, 16  ;;  %v817_v46 = vshrl.u32 %v3871_v37, 16  ;;  %v1020_v49 = vsel %vm3802_vm8, %v2798_v36, %v1019_v50  ;;  %v815_v4 = vsel %vm3887_vm12, %v3847_v17, %v3853_v25 }
 0x112   : > { %v820_v53 = vshll.u32 %v3871_v37, 16  ;;  %v828_v54 = vrot.slane %v826_v38, 5  ;;  %v1027_v56 = vrot.slane %v3855_v26, 5  ;;  %v714_v58 = vor.u32 %v712_v32, %v711_v40  ;;  %v3339_v63 = vld [vmem:[#allocation2 + $0x8] ss:$8 sps:$4 sm:$0xff]   ;;  %v3349_v39 = vld [vmem:[%s4408_s4 + $0x1b8] sm:$0xff]  }
 0x113   : > { %v715_v59 = vrot.slane %v711_v40, 4  ;;  %v695_v60 = vrot.slane %v693_v41, 7  ;;  %v2805_v0 = vcombine.low %v3811_v2, %v1020_v49  ;;  %v819_v5 = vrot.slane %v817_v46, 4  ;;  %v793_v7 = vld [vmem:[#allocation2 + $0x14] sm:$0x1]  ;;  %1253 = vmatprep.mubr.bf16.mxu1 %v3339_v63 }
 0x114   : > { %v822_v6 = vrot.slane %v820_v53, 5  ;;  %v988_v9 = vld [vmem:[#allocation2 + $0x10] sm:$0xe]  ;;  %v778_v10 = vsel %vm3817_vm9, %v714_v58, %v777_v34  ;;  %v3342_v12 = vld [vmem:[#allocation2 + $0x18] ss:$8 sps:$4 sm:$0xff]   ;;  %v1023_v17 = vrot.slane %v793_v7, 5  ;;  %v2789_v8 = vcombine.low %v3766_v27, %v3871_v37 }
 0x115   : > { %v781_v2 = vsel %vm3627_vm3, %v715_v59, %v780_v35  ;;  %v698_v28 = vor.u32 %v696_v44, %v695_v60  ;;  %v699_v11 = vrot.slane %v695_v60, 4  ;;  %v3899_v13 = vld [vmem:[#allocation2 + $0x10] sm:$0xf]  ;;  %779 = vst [vmem:[#allocation2 + $0x40] sm:$0xf] %v778_v10  ;;  %1254 = vmatmul.mubr.bf16.vlgmr.msra.gmra.mxu1 %v2805_v0  ;;  %v2799_v15 = vrot.slane %v988_v9, 9 }
 0x116   : > { %782 = vst [vmem:[#allocation2 + $0x44] sm:$0x1] %v781_v2  ;;  %v823_v14 = vor.u32 %v822_v6, %v819_v5  ;;  %v2800_v18 = vrot.slane %v989_v55, 9  ;;  %v3901_v19 = vld [vmem:[#allocation2 + $0x18] sm:$0xf]  ;;  %3064 = vmatpush3.bf16.msra.mxu1 %v3341_v45  ;;  %1261 = vmatprep.mubr.bf16.mxu1 %v3342_v12  ;;  %v831_v25 = vshrl.u32 %v3899_v13, 16 }
 0x117   : > { %v766_v21 = vsel %vm3817_vm9, %v698_v28, %v765_v47  ;;  %v769_v22 = vsel %vm3627_vm3, %v699_v11, %v768_v48  ;;  %v834_v43 = vshll.u32 %v3899_v13, 16  ;;  %3065 = vmatprep.subr.bf16.mxu1 %v3345_v52  ;;  %v1024_v29 = vsel %vm3802_vm8, %v2799_v15, %v1023_v17  ;;  %v3925_v27 = vld [vmem:[#allocation2 + $0x20] sm:$0xf]  ;;  %v3933_v36 = vld [vmem:[#allocation2 + $0x24] sm:$0x1]  ;;  %v3351_v44 = vld [vmem:[%s4408_s4 + $0x128] sm:$0xff]  }
 0x118   : > { %767 = vst [vmem:[#allocation2 + $0x30] sm:$0xf] %v766_v21  ;;  %770 = vst [vmem:[#allocation2 + $0x34] sm:$0x1] %v769_v22  ;;  %v824_v57 = vrot.slane %v823_v14, 4  ;;  %v840_v30 = vshll.u32 %v793_v7, 16  ;;  %v1028_v62 = vsel %vm3802_vm8, %v2800_v18, %v1027_v56  ;;  %v2790_v2 = vcombine.low %v3899_v13, %v3901_v19 }
 0x119   : > { %v833_v32 = vrot.slane %v831_v25, 4  ;;  %v836_v20 = vrot.slane %v834_v43, 5  ;;  %v845_v33 = vshrl.u32 %v3901_v19, 16  ;;  %v2806_v51 = vcombine.low %v1024_v29, %v1028_v62  ;;  %v3931_v35 = vld [vmem:[#allocation2 + $0x28] sm:$0xf]  ;;  %v3353_v45 = vld [vmem:[%s4408_s4 + $0x1f0] sm:$0xff]  }
 0x11a   : > { %v829_v50 = vsel %vm3887_vm12, %v824_v57, %v828_v54  ;;  %v848_v3 = vshll.u32 %v3901_v19, 16  ;;  %v854_v34 = vshll.u32 %v3855_v26, 16  ;;  %3066 = vmatpush3.bf16.msra.mxu1 %v3346_v24  ;;  %v842_v40 = vrot.slane %v840_v30, 5  ;;  %v3355_v26 = vld [vmem:[%s4408_s4 + $0x160] sm:$0xff]   ;;  %v796_v48 = vld [vmem:[#allocation2 + $0x2c] sm:$0x1] }
 0x11b   : > { %v2793_v37 = vcombine.low %v815_v4, %v829_v50  ;;  %v837_v38 = vor.u32 %v836_v20, %v833_v32  ;;  %v847_v41 = vrot.slane %v845_v33, 4  ;;  %3067 = vmatprep.subr.bf16.mxu1 %v3350_v16  ;;  %v859_v49 = vshrl.u32 %v3925_v27, 16  ;;  %v990_v53 = vld [vmem:[#allocation2 + $0x20] sm:$0xe]  ;;  %v3354_v55 = vld [vmem:[%s4408_s4 + $0x1b0] sm:$0xff]   ;;  %v3358_v0 = vld [vmem:[%s4408_s4 + $0x1e8] sm:$0xff]  }
 0x11c   : > { %v850_v46 = vrot.slane %v848_v3, 5  ;;  %v856_v47 = vrot.slane %v854_v34, 5  ;;  %v862_v52 = vshll.u32 %v3925_v27, 16  ;;  %v3356_v56 = vld [vmem:[%s4408_s4 + $0x120] sm:$0xff]   ;;  %v868_v58 = vshll.u32 %v3933_v36, 16  ;;  %v3360_v18 = vld [vmem:[%s4408_s4 + $0x158] sm:$0xff]  }
 0x11d   : > { %1414 = vmatprep.mubr.bf16.mxu0 %v2793_v37  ;;  %v838_v54 = vrot.slane %v837_v38, 4  ;;  %v873_v59 = vshrl.u32 %v3931_v35, 16  ;;  %v876_v60 = vshll.u32 %v3931_v35, 16  ;;  %1262 = vmatmul.mubr.bf16.gmra.mxu1 %v2806_v51  ;;  %v861_v4 = vrot.slane %v859_v49, 4  ;;  %v991_v7 = vld [vmem:[#allocation2 + $0x28] sm:$0xe] }
 0x11e   : > { %1415 = vmatmul.mubr.bf16.vlgmr.msra.gmra.mxu0 %v2789_v8  ;;  %v851_v63 = vor.u32 %v850_v46, %v847_v41  ;;  %v864_v5 = vrot.slane %v862_v52, 5  ;;  %v882_v6 = vshll.u32 %v796_v48, 16  ;;  %3068 = vmatpush3.bf16.msra.mxu1 %v3351_v44  ;;  %v870_v28 = vrot.slane %v868_v58, 5  ;;  %v3359_v22 = vld [vmem:[%s4408_s4 + $0x1a8] sm:$0xff]   ;;  %v3361_v16 = vld [vmem:[%s4408_s4 + $0x118] sm:$0xff]   ;;  %v3363_v29 = vld [vmem:[%s4408_s4 + $0x1e0] sm:$0xff]  }
 0x11f   : > { %3104 = vmatpush3.bf16.msra.mxu0 %v3349_v39  ;;  %v843_v9 = vsel %vm3887_vm12, %v838_v54, %v842_v40  ;;  %v3352_v10 = vld [vmem:[#allocation2 + $0x28] ss:$8 sps:$4 sm:$0xff]   ;;  %v875_v11 = vrot.slane %v873_v59, 4  ;;  %3069 = vmatprep.subr.bf16.mxu1 %v3355_v26  ;;  %v878_v15 = vrot.slane %v876_v60, 5  ;;  %v2801_v13 = vrot.slane %v990_v53, 9  ;;  %v3364_v44 = vld [vmem:[%s4408_s4 + $0x1a0] sm:$0xff]  }
 0x120   : > { %v852_v12 = vrot.slane %v851_v63, 4  ;;  %3105 = vmatprep.subr.bf16.mxu0 %v3353_v45  ;;  %v865_v14 = vor.u32 %v864_v5, %v861_v4  ;;  %v884_v17 = vrot.slane %v882_v6, 5  ;;  %v3965_v21 = vld [vmem:[#allocation2 + $0x30] sm:$0xf]  ;;  %1269 = vmatprep.mubr.bf16.mxu1 %v3352_v10  ;;  %v1031_v19 = vrot.slane %v3933_v36, 5  ;;  %v3368_v54 = vld [vmem:[%s4408_s4 + $0x1d8] sm:$0xff]  }
 0x121   : > { %v2802_v24 = vrot.slane %v991_v7, 9  ;;  %v1035_v25 = vrot.slane %v796_v48, 5  ;;  %v879_v8 = vor.u32 %v878_v15, %v875_v11  ;;  %v3979_v30 = vld [vmem:[#allocation2 + $0x38] sm:$0xf]  ;;  %v887_v39 = vshrl.u32 %v3965_v21, 16  ;;  %v3365_v33 = vld [vmem:[%s4408_s4 + $0x150] sm:$0xff]  }
 0x122   : > { %v857_v43 = vsel %vm3887_vm12, %v852_v12, %v856_v47  ;;  %v866_v57 = vrot.slane %v865_v14, 4  ;;  %3070 = vmatpush3.bf16.msra.mxu1 %v3356_v56  ;;  %v1032_v32 = vsel %vm3802_vm8, %v2801_v13, %v1031_v19  ;;  %v797_v50 = vld [vmem:[#allocation2 + $0x34] sm:$0x1]  ;;  %v890_v51 = vshll.u32 %v3965_v21, 16  ;;  %v992_v3 = vld [vmem:[#allocation2 + $0x30] sm:$0xe] }
 0x123   : > { %v2794_v62 = vcombine.low %v843_v9, %v857_v43  ;;  %3106 = vmatpush3.bf16.msra.mxu0 %v3354_v55  ;;  %v1036_v20 = vsel %vm3802_vm8, %v2802_v24, %v1035_v25  ;;  %v880_v36 = vrot.slane %v879_v8, 4  ;;  %3071 = vmatprep.subr.bf16.mxu1 %v3360_v18  ;;  %v798_v38 = vld [vmem:[#allocation2 + $0x3c] sm:$0x1]  ;;  %v889_v40 = vrot.slane %v887_v39, 4  ;;  %v3992_v41 = vld [vmem:[#allocation2 + $0xc] sm:$0x1] }
 0x124   : > { %3107 = vmatprep.subr.bf16.mxu0 %v3358_v0  ;;  %v871_v34 = vsel %vm3887_vm12, %v866_v57, %v870_v28  ;;  %v2807_v37 = vcombine.low %v1032_v32, %v1036_v20  ;;  %v3366_v45 = vld [vmem:[%s4408_s4 + $0x110] sm:$0xff]   ;;  %v892_v26 = vrot.slane %v890_v51, 5  ;;  %v896_v46 = vshll.u32 %v797_v50, 16  ;;  %v993_v49 = vld [vmem:[#allocation2 + $0x38] sm:$0xe]  ;;  %v3370_v56 = vld [vmem:[%s4408_s4 + $0x148] sm:$0xff]  }
 0x125   : > { %1422 = vmatprep.mubr.bf16.mxu0 %v2794_v62  ;;  %v901_v47 = vshrl.u32 %v3979_v30, 16  ;;  %v904_v48 = vshll.u32 %v3979_v30, 16  ;;  %v885_v52 = vsel %vm3887_vm12, %v880_v36, %v884_v17  ;;  %v3362_v53 = vld [vmem:[#allocation2 + $0x38] ss:$8 sps:$4 sm:$0xff]   ;;  %v910_v55 = vshll.u32 %v798_v38, 16  ;;  %v3371_v57 = vld [vmem:[%s4408_s4 + $0x108] sm:$0xff]  }
 0x126   : > { %1423 = vmatmul.mubr.bf16.gmra.mxu0 %v2790_v2  ;;  %1270 = vmatmul.mubr.bf16.gmra.mxu1 %v2807_v37  ;;  %v2803_v58 = vrot.slane %v992_v3, 9  ;;  %v1039_v59 = vrot.slane %v797_v50, 5  ;;  %v2795_v60 = vcombine.low %v871_v34, %v885_v52  ;;  %v893_v63 = vor.u32 %v892_v26, %v889_v40  ;;  %v1575_v4 = vld [vmem:[#allocation2 + $0x8] sm:$0xe]  ;;  %v1576_v5 = vld [vmem:[#allocation2 + $0x10] sm:$0xe] }
 0x127   : > { %3108 = vmatpush3.bf16.msra.mxu0 %v3359_v22  ;;  %3072 = vmatpush3.bf16.msra.mxu1 %v3361_v16  ;;  %v903_v0 = vrot.slane %v901_v47, 4  ;;  %v4012_v6 = vrot.slane %v1989_v42, 5  ;;  %v898_v7 = vrot.slane %v896_v46, 5  ;;  %v906_v9 = vrot.slane %v904_v48, 5  ;;  %v4014_v28 = vld [vmem:[#allocation2 + $0x14] sm:$0x1] }
 0x128   : > { %1277 = vmatprep.mubr.bf16.mxu1 %v3362_v53  ;;  %3109 = vmatprep.subr.bf16.mxu0 %v3363_v29  ;;  %v912_v10 = vrot.slane %v910_v55, 5  ;;  %v2804_v2 = vrot.slane %v993_v49, 9  ;;  %v894_v11 = vrot.slane %v893_v63, 4  ;;  %v1040_v12 = vsel %vm3802_vm8, %v2803_v58, %v1039_v59  ;;  %v4019_v23 = vld [vmem:[#allocation2 + $0x10] sm:$0xf]  ;;  %v3369_v25 = vld [vmem:[%s4408_s4 + $0x198] sm:$0xff]  }
 0x129   : > { %1430 = vmatprep.mubr.bf16.mxu0 %v2795_v60  ;;  %3073 = vmatprep.subr.bf16.mxu1 %v3365_v33  ;;  %v1043_v14 = vrot.slane %v798_v38, 5  ;;  %v1473_v15 = vshll.u32 %v3992_v41, 16  ;;  %v907_v42 = vor.u32 %v906_v9, %v903_v0  ;;  %v2845_v17 = vrot.slane %v1575_v4, 9  ;;  %v4022_v13 = vld [vmem:[#allocation2 + $0x14] sm:$0x1]  ;;  %v3374_v32 = vld [vmem:[%s4408_s4 + $0x140] sm:$0xff]  }
 0x12a   : > { %v1601_v18 = vrot.slane %v3992_v41, 5  ;;  %v2846_v22 = vrot.slane %v1576_v5, 9  ;;  %v2791_v19 = vcombine.low %v3925_v27, %v3931_v35  ;;  %v899_v24 = vsel %vm3887_vm12, %v894_v11, %v898_v7  ;;  %v4037_v16 = vld [vmem:[#allocation2 + $0x18] sm:$0xf]  ;;  %v3372_v62 = vld [vmem:[%s4408_s4 + $0x1d0] sm:$0xff]   ;;  %v3375_v46 = vld [vmem:[%s4408_s4 + $0x100] sm:$0xff]  }
 0x12b   : > { %3110 = vmatpush3.bf16.msra.mxu0 %v3364_v44  ;;  %3074 = vmatpush3.bf16.msra.mxu1 %v3366_v45  ;;  %v1044_v43 = vsel %vm3802_vm8, %v2804_v2, %v1043_v14  ;;  %v1487_v8 = vshll.u32 %v4014_v28, 16  ;;  %v908_v27 = vrot.slane %v907_v42, 4  ;;  %v4039_v29 = vrot.slane %v1473_v15, 5  ;;  %v4050_v33 = vld [vmem:[#allocation2 + $0x1c] sm:$0x1]  ;;  %v3373_v26 = vld [vmem:[%s4408_s4 + $0x190] sm:$0xff]  }
 0x12c   : > { %3111 = vmatprep.subr.bf16.mxu0 %v3368_v54  ;;  %3075 = vmatprep.subr.bf16.mxu1 %v3370_v56  ;;  %v2808_v35 = vcombine.low %v1040_v12, %v1044_v43  ;;  %v1605_v39 = vrot.slane %v4014_v28, 5  ;;  %v1602_v20 = vsel %vm3802_vm8, %v2845_v17, %v1601_v18  ;;  %v1882_v50 = vshrl.u32 %v4019_v23, 16  ;;  %v1447_v40 = vld [vmem:[#allocation2 + $0x8] sm:$0xf]  ;;  %v1449_v41 = vld [vmem:[#allocation2 + $0x10] sm:$0xf] }
 0x12d   : > { %v1885_v51 = vshll.u32 %v4019_v23, 16  ;;  %v1891_v3 = vshll.u32 %v4022_v13, 16  ;;  %v913_v34 = vsel %vm3887_vm12, %v908_v27, %v912_v10  ;;  %v1896_v37 = vshrl.u32 %v4037_v16, 16  ;;  %v3377_v47 = vld [vmem:[%s4408_s4 + $0x1c8] sm:$0xff]   ;;  %v4076_v56 = vld [vmem:[%s4408_s4 + $0x238] sm:$0xff]   ;;  %v3381_v28 = vld [vmem:[%s4408_s4 + $0x180] sm:$0xff]  }
 0x12e   : > { %1431 = vmatmul.mubr.bf16.gmra.mxu0 %v2791_v19  ;;  %1278 = vmatmul.mubr.bf16.gmra.mxu1 %v2808_v35  ;;  %v1606_v36 = vsel %vm3802_vm8, %v2846_v22, %v1605_v39  ;;  %v1899_v38 = vshll.u32 %v4037_v16, 16  ;;  %v2796_v44 = vcombine.low %v899_v24, %v913_v34  ;;  %v1884_v48 = vrot.slane %v1882_v50, 4  ;;  %v4078_v58 = vld [vmem:[#allocation2 + $0x1c] sm:$0x1]  ;;  %v1577_v59 = vld [vmem:[#allocation2 + $0x18] sm:$0xe] }
 0x12f   : > { %3112 = vmatpush3.bf16.msra.mxu0 %v3369_v25  ;;  %3076 = vmatpush3.bf16.msra.mxu1 %v3371_v57  ;;  %v2857_v45 = vcombine.low %v1602_v20, %v1606_v36  ;;  %v1887_v49 = vrot.slane %v1885_v51, 5  ;;  %v2792_v52 = vcombine.low %v3965_v21, %v3979_v30  ;;  %v1898_v53 = vrot.slane %v1896_v37, 4  ;;  %v1578_v5 = vld [vmem:[#allocation2 + $0x20] sm:$0xe]  ;;  %v3378_v21 = vld [vmem:[%s4408_s4 + $0x188] sm:$0xff]  }
 0x130   : > { %3113 = vmatprep.subr.bf16.mxu0 %v3372_v62  ;;  %3077 = vmatprep.subr.bf16.mxu1 %v3374_v32  ;;  %v1901_v54 = vrot.slane %v1899_v38, 5  ;;  %v1905_v55 = vshll.u32 %v4050_v33, 16  ;;  %v1464_v63 = vshrl.u32 %v1447_v40, 16  ;;  %v1467_v0 = vshll.u32 %v1447_v40, 16  ;;  %v4083_v2 = vld [vmem:[#allocation2 + $0x24] sm:$0x1] }
 0x131   : > { %1438 = vmatprep.mubr.bf16.mxu0 %v2796_v44  ;;  %1823 = vmatprep.mubr.bf16.mxu1 %v2857_v45  ;;  %v1888_v60 = vor.u32 %v1887_v49, %v1884_v48  ;;  %v1478_v4 = vshrl.u32 %v1449_v41, 16  ;;  %v1893_v30 = vrot.slane %v1891_v3, 5  ;;  %v1481_v10 = vshll.u32 %v1449_v41, 16  ;;  %v4085_v42 = vld [vmem:[#allocation2 + $0x20] sm:$0xf] }
 0x132   : > { %v1902_v7 = vor.u32 %v1901_v54, %v1898_v53  ;;  %v1907_v9 = vrot.slane %v1905_v55, 5  ;;  %v1466_v12 = vrot.slane %v1464_v63, 4  ;;  %v1469_v14 = vrot.slane %v1467_v0, 5  ;;  %v3380_v24 = vld [vmem:[%s4408_s4 + $0x1c0] sm:$0xff]   ;;  %v4101_v20 = vld [vmem:[#allocation2 + $0x28] sm:$0xf] }
 0x133   : > { %3114 = vmatpush3.bf16.msra.mxu0 %v3373_v26  ;;  %3078 = vmatpush3.bf16.msra.mxu1 %v3375_v46  ;;  %v1889_v11 = vrot.slane %v1888_v60, 4  ;;  %v1480_v15 = vrot.slane %v1478_v4, 4  ;;  %v1483_v18 = vrot.slane %v1481_v10, 5  ;;  %v2847_v22 = vrot.slane %v1577_v59, 9  ;;  %v4095_v35 = vld [vmem:[#allocation2 + $0x24] sm:$0x1] }
 0x134   : > { %3115 = vmatprep.subr.bf16.mxu0 %v3377_v47  ;;  %v1903_v17 = vrot.slane %v1902_v7, 4  ;;  %3191 = vmatprep.subr.bf16.mxu1 %v4076_v56  ;;  %v2848_v19 = vrot.slane %v1578_v5, 9  ;;  %v1470_v43 = vor.u32 %v1469_v14, %v1466_v12  ;;  %v1609_v57 = vrot.slane %v4078_v58, 5  ;;  %v4112_v38 = vld [vmem:[#allocation2 + $0x2c] sm:$0x1]  ;;  %v3382_v54 = vld [vmem:[%s4408_s4 + $0x230] sm:$0xff]  }
 0x135   : > { %v1894_v25 = vsel %vm3887_vm12, %v1889_v11, %v1893_v30  ;;  %v1613_v27 = vrot.slane %v4083_v2, 5  ;;  %v1489_v39 = vrot.slane %v1487_v8, 5  ;;  %v1484_v32 = vor.u32 %v1483_v18, %v1480_v15  ;;  %v1451_v47 = vld [vmem:[#allocation2 + $0x18] sm:$0xf]  ;;  %v4128_v5 = vld [vmem:[#allocation2 + $0x2c] sm:$0x1] }
 0x136   : > { %1439 = vmatmul.mubr.bf16.gmra.mxu0 %v2792_v52  ;;  %v1908_v62 = vsel %vm3887_vm12, %v1903_v17, %v1907_v9  ;;  %v1910_v50 = vshrl.u32 %v4085_v42, 16  ;;  %v1471_v3 = vrot.slane %v1470_v43, 4  ;;  %v1913_v8 = vshll.u32 %v4085_v42, 16  ;;  %v1453_v52 = vld [vmem:[#allocation2 + $0x20] sm:$0xf] }
 0x137   : > { %3116 = vmatpush3.bf16.msra.mxu0 %v3378_v21  ;;  %v2881_v51 = vcombine.low %v1894_v25, %v1908_v62  ;;  %v1614_v34 = vsel %vm3802_vm8, %v2848_v19, %v1613_v27  ;;  %v1485_v36 = vrot.slane %v1484_v32, 4  ;;  %v2877_v37 = vcombine.low %v4019_v23, %v4037_v16  ;;  %v4130_v21 = vld [vmem:[#allocation2 + $0x34] sm:$0x1]  ;;  %v1579_v11 = vld [vmem:[#allocation2 + $0x28] sm:$0xe] }
 0x138   : > { %3117 = vmatprep.subr.bf16.mxu0 %v3380_v24  ;;  %v1912_v40 = vrot.slane %v1910_v50, 4  ;;  %v1919_v41 = vshll.u32 %v4095_v35, 16  ;;  %v1610_v44 = vsel %vm3802_vm8, %v2847_v22, %v1609_v57  ;;  %v1915_v45 = vrot.slane %v1913_v8, 5  ;;  %v1580_v18 = vld [vmem:[#allocation2 + $0x30] sm:$0xe] }
 0x139   : > { %2193 = vmatprep.mubr.bf16.mxu0 %v2881_v51  ;;  %v1924_v26 = vshrl.u32 %v4101_v20, 16  ;;  %v1927_v46 = vshll.u32 %v4101_v20, 16  ;;  %v1476_v48 = vsel %vm3887_vm12, %v1471_v3, %v4039_v29  ;;  %v1490_v23 = vsel %vm3887_vm12, %v1485_v36, %v1489_v39  ;;  %v4140_v39 = vld [vmem:[#allocation2 + $0x30] sm:$0xf]  ;;  %v4151_v36 = vld [vmem:[#allocation2 + $0x38] sm:$0xf] }
 0x13a   : > { %v2858_v16 = vcombine.low %v1610_v44, %v1614_v34  ;;  %v1933_v49 = vshll.u32 %v4112_v38, 16  ;;  %v2853_v53 = vcombine.low %v1476_v48, %v1490_v23  ;;  %v1916_v55 = vor.u32 %v1915_v45, %v1912_v40  ;;  %v4164_v48 = vld [vmem:[#allocation2 + $0x3c] sm:$0x1] }
 0x13b   : > { %3118 = vmatpush3.bf16.msra.mxu0 %v3381_v28  ;;  %v1926_v59 = vrot.slane %v1924_v26, 4  ;;  %v1929_v60 = vrot.slane %v1927_v46, 5  ;;  %v1921_v63 = vrot.slane %v1919_v41, 5  ;;  %v1492_v4 = vshrl.u32 %v1451_v47, 16  ;;  %v3385_v28 = vld [vmem:[%s4408_s4 + $0x220] sm:$0xff]  }
 0x13c   : > { %v1935_v0 = vrot.slane %v1933_v49, 5  ;;  %v1495_v29 = vshll.u32 %v1451_v47, 16  ;;  %1824 = vmatmul.mubr.bf16.vlgmr.msra.gmra.mxu1 %v2853_v53  ;;  %v1917_v30 = vrot.slane %v1916_v55, 4  ;;  %v1501_v9 = vshll.u32 %v4078_v58, 16  ;;  %v3384_v58 = vld [vmem:[%s4408_s4 + $0x228] sm:$0xff]  }
 0x13d   : > { %v1930_v7 = vor.u32 %v1929_v60, %v1926_v59  ;;  %v1506_v10 = vshrl.u32 %v1453_v52, 16  ;;  %3192 = vmatpush3.bf16.msra.mxu1 %v4076_v56  ;;  %1831 = vmatprep.mubr.bf16.mxu1 %v2858_v16  ;;  %v1494_v12 = vrot.slane %v1492_v4, 4  ;;  %v1509_v15 = vshll.u32 %v1453_v52, 16  ;;  %v4157_v41 = vld [vmem:[#allocation2 + $0x34] sm:$0x1] }
 0x13e   : > { %v1497_v14 = vrot.slane %v1495_v29, 5  ;;  %v1515_v17 = vshll.u32 %v4083_v2, 16  ;;  %3193 = vmatprep.subr.bf16.mxu1 %v3382_v54  ;;  %2194 = vmatmul.mubr.bf16.vlgmr.msra.gmra.mxu0 %v2877_v37  ;;  %v1922_v22 = vsel %vm3887_vm12, %v1917_v30, %v1921_v63  ;;  %v1503_v24 = vrot.slane %v1501_v9, 5  ;;  %v1455_v26 = vld [vmem:[#allocation2 + $0x28] sm:$0xf]  ;;  %v3387_v30 = vld [vmem:[%s4408_s4 + $0x218] sm:$0xff]  }
 0x13f   : > { %v1931_v19 = vrot.slane %v1930_v7, 4  ;;  %v1508_v25 = vrot.slane %v1506_v10, 4  ;;  %v1511_v43 = vrot.slane %v1509_v15, 5  ;;  %v2849_v27 = vrot.slane %v1579_v11, 9  ;;  %v1457_v59 = vld [vmem:[#allocation2 + $0x30] sm:$0xf] }
 0x140   : > { %v1498_v56 = vor.u32 %v1497_v14, %v1494_v12  ;;  %v1517_v57 = vrot.slane %v1515_v17, 5  ;;  %v1617_v62 = vrot.slane %v4128_v5, 5  ;;  %v2850_v32 = vrot.slane %v1580_v18, 9  ;;  %v1581_v7 = vld [vmem:[#allocation2 + $0x38] sm:$0xe] }
 0x141   : > { %v1936_v2 = vsel %vm3887_vm12, %v1931_v19, %v1935_v0  ;;  %v1621_v50 = vrot.slane %v4130_v21, 5  ;;  %3194 = vmatpush3.bf16.msra.mxu1 %v3382_v54  ;;  %v1512_v34 = vor.u32 %v1511_v43, %v1508_v25  ;;  %v2878_v8 = vcombine.low %v4085_v42, %v4101_v20  ;;  %v4175_v14 = vld [vmem:[#allocation2 + $0x3c] sm:$0x1]  ;;  %v1582_v19 = vld [vmem:[#allocation2 + $0x40] sm:$0xe] }
 0x142   : > { %v2882_v51 = vcombine.low %v1922_v22, %v1936_v2  ;;  %v1499_v3 = vrot.slane %v1498_v56, 4  ;;  %3195 = vmatprep.subr.bf16.mxu1 %v3384_v58  ;;  %v1618_v37 = vsel %vm3802_vm8, %v2849_v27, %v1617_v62  ;;  %v1938_v44 = vshrl.u32 %v4140_v39, 16  ;;  %v4178_v56 = vld [vmem:[#allocation2 + $0x44] sm:$0x1]  ;;  %v3388_v62 = vld [vmem:[%s4408_s4 + $0x210] sm:$0xff]  }
 0x143   : > { %v1622_v40 = vsel %vm3802_vm8, %v2850_v32, %v1621_v50  ;;  %v1941_v45 = vshll.u32 %v4140_v39, 16  ;;  %v1513_v20 = vrot.slane %v1512_v34, 4  ;;  %v1947_v47 = vshll.u32 %v4157_v41, 16  ;;  %v4185_v32 = vld [vmem:[#allocation2 + $0x40] sm:$0xf] }
 0x144   : > { %2201 = vmatprep.mubr.bf16.mxu0 %v2882_v51  ;;  %v1504_v42 = vsel %vm3887_vm12, %v1499_v3, %v1503_v24  ;;  %v2859_v46 = vcombine.low %v1618_v37, %v1622_v40  ;;  %v1940_v23 = vrot.slane %v1938_v44, 4  ;;  %v1952_v49 = vshrl.u32 %v4151_v36, 16  ;;  %v1459_v40 = vld [vmem:[#allocation2 + $0x38] sm:$0xf] }
 0x145   : > { %v1943_v16 = vrot.slane %v1941_v45, 5  ;;  %v1955_v52 = vshll.u32 %v4151_v36, 16  ;;  %v1518_v53 = vsel %vm3887_vm12, %v1513_v20, %v1517_v57  ;;  %3196 = vmatpush3.bf16.msra.mxu1 %v3384_v58  ;;  %v1949_v54 = vrot.slane %v1947_v47, 5 }
 0x146   : > { %v1961_v55 = vshll.u32 %v4164_v48, 16  ;;  %v1520_v60 = vshrl.u32 %v1455_v26, 16  ;;  %v2854_v63 = vcombine.low %v1504_v42, %v1518_v53  ;;  %3197 = vmatprep.subr.bf16.mxu1 %v3385_v28  ;;  %2202 = vmatmul.mubr.bf16.gmra.mxu0 %v2878_v8  ;;  %v1954_v4 = vrot.slane %v1952_v49, 4  ;;  %v4195_v42 = vld [vmem:[#allocation2 + $0x44] sm:$0x1] }
 0x147   : > { %v1944_v0 = vor.u32 %v1943_v16, %v1940_v23  ;;  %v1957_v29 = vrot.slane %v1955_v52, 5  ;;  %v1523_v11 = vshll.u32 %v1455_v26, 16  ;;  %v1529_v12 = vshll.u32 %v4128_v5, 16  ;;  %v1461_v16 = vld [vmem:[#allocation2 + $0x40] sm:$0xf] }
 0x148   : > { %v1963_v9 = vrot.slane %v1961_v55, 5  ;;  %v1522_v10 = vrot.slane %v1520_v60, 4  ;;  %1832 = vmatmul.mubr.bf16.gmra.mxu1 %v2854_v63  ;;  %v1534_v18 = vshrl.u32 %v1457_v59, 16  ;;  %v1537_v22 = vshll.u32 %v1457_v59, 16 }
 0x149   : > { %v1945_v15 = vrot.slane %v1944_v0, 4  ;;  %v1958_v17 = vor.u32 %v1957_v29, %v1954_v4  ;;  %1839 = vmatprep.mubr.bf16.mxu1 %v2859_v46  ;;  %3198 = vmatpush3.bf16.msra.mxu1 %v3385_v28  ;;  %v1525_v58 = vrot.slane %v1523_v11, 5  ;;  %v1531_v24 = vrot.slane %v1529_v12, 5  ;;  %v2234_v12 = vld [vmem:[#allocation2 + $0x10] sm:$0xe] }
 0x14a   : > { %v1543_v25 = vshll.u32 %v4130_v21, 16  ;;  %v2851_v43 = vrot.slane %v1581_v7, 9  ;;  %3199 = vmatprep.subr.bf16.mxu1 %v3387_v30  ;;  %v1536_v27 = vrot.slane %v1534_v18, 4  ;;  %v1539_v2 = vrot.slane %v1537_v22, 5 }
 0x14b   : > { %v1950_v5 = vsel %vm3887_vm12, %v1945_v15, %v1949_v54  ;;  %v1959_v57 = vrot.slane %v1958_v17, 4  ;;  %v1526_v50 = vor.u32 %v1525_v58, %v1522_v10  ;;  %v1625_v21 = vrot.slane %v4175_v14, 5  ;;  %v3391_v15 = vld [vmem:[%s4408_s4 + $0x200] sm:$0xff]  }
 0x14c   : > { %v1545_v51 = vrot.slane %v1543_v25, 5  ;;  %v2852_v3 = vrot.slane %v1582_v19, 9  ;;  %v1540_v28 = vor.u32 %v1539_v2, %v1536_v27  ;;  %v1629_v8 = vrot.slane %v4178_v56, 5 }
 0x14d   : > { %v1964_v34 = vsel %vm3887_vm12, %v1959_v57, %v1963_v9  ;;  %v2879_v37 = vcombine.low %v4140_v39, %v4151_v36  ;;  %v1527_v45 = vrot.slane %v1526_v50, 4  ;;  %3200 = vmatpush3.bf16.msra.mxu1 %v3387_v30  ;;  %v1626_v26 = vsel %vm3802_vm8, %v2851_v43, %v1625_v21  ;;  %v3390_v36 = vld [vmem:[%s4408_s4 + $0x208] sm:$0xff]  }
 0x14e   : > { %v2883_v44 = vcombine.low %v1950_v5, %v1964_v34  ;;  %v1966_v20 = vshrl.u32 %v4185_v32, 16  ;;  %v1541_v46 = vrot.slane %v1540_v28, 4  ;;  %v1630_v47 = vsel %vm3802_vm8, %v2852_v3, %v1629_v8  ;;  %3201 = vmatprep.subr.bf16.mxu1 %v3388_v62  ;;  %v2237_v3 = vld [vmem:[#allocation2 + $0x28] sm:$0xe]  ;;  %v2238_v28 = vld [vmem:[#allocation2 + $0x30] sm:$0xe] }
 0x14f   : > { %v1969_v23 = vshll.u32 %v4185_v32, 16  ;;  %v1975_v39 = vshll.u32 %v4195_v42, 16  ;;  %v1532_v49 = vsel %vm3887_vm12, %v1527_v45, %v1531_v24  ;;  %v2860_v52 = vcombine.low %v1626_v26, %v1630_v47  ;;  %v2235_v24 = vld [vmem:[#allocation2 + $0x18] sm:$0xe] }
 0x150   : > { %2209 = vmatprep.mubr.bf16.mxu0 %v2883_v44  ;;  %v1968_v53 = vrot.slane %v1966_v20, 4  ;;  %v1548_v54 = vshrl.u32 %v1459_v40, 16  ;;  %v1546_v55 = vsel %vm3887_vm12, %v1541_v46, %v1545_v51  ;;  %v1551_v63 = vshll.u32 %v1459_v40, 16  ;;  %v3405_v51 = vld [vmem:[#allocation2 + $0x48] sm:$0xf] }
 0x151   : > { %2210 = vmatmul.mubr.bf16.gmra.mxu0 %v2879_v37  ;;  %v1971_v59 = vrot.slane %v1969_v23, 5  ;;  %v1977_v60 = vrot.slane %v1975_v39, 5  ;;  %v2855_v0 = vcombine.low %v1532_v49, %v1546_v55  ;;  %3202 = vmatpush3.bf16.msra.mxu1 %v3388_v62  ;;  %v1557_v29 = vshll.u32 %v4175_v14, 16  ;;  %v2239_v8 = vld [vmem:[#allocation2 + $0x38] sm:$0xe] }
 0x152   : > { %v1550_v4 = vrot.slane %v1548_v54, 4  ;;  %v1562_v30 = vshrl.u32 %v1461_v16, 16  ;;  %3203 = vmatprep.subr.bf16.mxu1 %v3390_v36  ;;  %v1553_v9 = vrot.slane %v1551_v63, 5  ;;  %v1565_v10 = vshll.u32 %v1461_v16, 16  ;;  %v2236_v40 = vld [vmem:[#allocation2 + $0x20] sm:$0xe] }
 0x153   : > { %v1972_v7 = vor.u32 %v1971_v59, %v1968_v53  ;;  %v1571_v11 = vshll.u32 %v4178_v56, 16  ;;  %1840 = vmatmul.mubr.bf16.gmra.mxu1 %v2855_v0  ;;  %v1992_v17 = vsel %vm3887_vm12, %v3860_v31, %v4012_v6  ;;  %v1559_v19 = vrot.slane %v1557_v29, 5  ;;  %v2240_v49 = vld [vmem:[#allocation2 + $0x40] sm:$0xe]  ;;  %v3406_v55 = vld [vmem:[#allocation2 + $0x4c] sm:$0x1] }
 0x154   : > { %v1564_v18 = vrot.slane %v1562_v30, 4  ;;  %1847 = vmatprep.mubr.bf16.mxu1 %v2860_v52  ;;  %v1554_v22 = vor.u32 %v1553_v9, %v1550_v4  ;;  %v1567_v58 = vrot.slane %v1565_v10, 5  ;;  %v2901_v25 = vrot.slane %v2234_v12, 9  ;;  %v3393_v4 = vld [vmem:[%s4411_s7 + $0x38] sm:$0xff]   ;;  %v3396_v29 = vld [vmem:[%s4411_s7 + $0x20] sm:$0xff]   ;;  %v3399_v9 = vld [vmem:[%s4411_s7 + $0x8] sm:$0xff]  }
 0x155   : > { %v1973_v14 = vrot.slane %v1972_v7, 4  ;;  %3204 = vmatpush3.bf16.msra.mxu1 %v3390_v36  ;;  %v2260_v56 = vrot.slane %v4022_v13, 5  ;;  %v1573_v27 = vrot.slane %v1571_v11, 5  ;;  %v2902_v31 = vrot.slane %v2235_v24, 9  ;;  %v2241_v36 = vld [vmem:[#allocation2 + $0x48] sm:$0xe]  ;;  %3215 = vmatprep.subr.bf16.mxu0 %v3393_v4 }
 0x156   : > { %v1555_v5 = vrot.slane %v1554_v22, 4  ;;  %v1568_v57 = vor.u32 %v1567_v58, %v1564_v18  ;;  %3205 = vmatprep.subr.bf16.mxu1 %v3391_v15  ;;  %v2264_v6 = vrot.slane %v4050_v33, 5  ;;  %v2880_v21 = vcombine.low %v4185_v32, %v3405_v51  ;;  %3216 = vmatpush3.bf16.msra.mxu0 %v3393_v4  ;;  %v3397_v30 = vld [vmem:[%s4411_s7 + $0x18] sm:$0xff]   ;;  %v3398_v7 = vld [vmem:[%s4411_s7 + $0x10] sm:$0xff]   ;;  %v3400_v10 = vld [vmem:[%s4411_s7] sm:$0xff]  }
 0x157   : > { %v1978_v43 = vsel %vm3887_vm12, %v1973_v14, %v1977_v60  ;;  %v2261_v13 = vsel %vm3802_vm8, %v2901_v25, %v2260_v56  ;;  %v2272_v44 = vrot.slane %v4112_v38, 5  ;;  %v2904_v45 = vrot.slane %v2237_v3, 9 }
 0x158   : > { %v2884_v2 = vcombine.low %v1978_v43, %v1992_v17  ;;  %v1560_v62 = vsel %vm3887_vm12, %v1555_v5, %v1559_v19  ;;  %v1569_v50 = vrot.slane %v1568_v57, 4  ;;  %v2265_v37 = vsel %vm3802_vm8, %v2902_v31, %v2264_v6 }
 0x159   : > { %3206 = vmatpush3.bf16.msra.mxu1 %v3391_v15  ;;  %v2909_v32 = vcombine.low %v2261_v13, %v2265_v37  ;;  %v2905_v26 = vrot.slane %v2238_v28, 9  ;;  %v2276_v20 = vrot.slane %v4157_v41, 5  ;;  %v2906_v46 = vrot.slane %v2239_v8, 9 }
 0x15a   : > { %2217 = vmatprep.mubr.bf16.mxu0 %v2884_v2  ;;  %v1574_v34 = vsel %vm3887_vm12, %v1569_v50, %v1573_v27  ;;  %v2280_v1 = vrot.slane %v4164_v48, 5  ;;  %v2268_v47 = vrot.slane %v4095_v35, 5  ;;  %v2903_v23 = vrot.slane %v2236_v40, 9  ;;  %3239 = vmatprep.subr.bf16.mxu1 %v3393_v4 }
 0x15b   : > { %2218 = vmatmul.mubr.bf16.gmra.mxu0 %v2880_v21  ;;  %v2856_v33 = vcombine.low %v1560_v62, %v1574_v34  ;;  %v2273_v39 = vsel %vm3802_vm8, %v2904_v45, %v2272_v44  ;;  %v2277_v38 = vsel %vm3802_vm8, %v2905_v26, %v2276_v20  ;;  %v2908_v48 = vrot.slane %v2241_v36, 9 }
 0x15c   : > { %v2281_v16 = vsel %vm3802_vm8, %v2906_v46, %v2280_v1  ;;  %v2269_v41 = vsel %vm3802_vm8, %v2903_v23, %v2268_v47  ;;  %v2907_v35 = vrot.slane %v2240_v49, 9  ;;  %v2284_v54 = vrot.slane %v4195_v42, 5  ;;  %v3394_v42 = vld [vmem:[%s4411_s7 + $0x30] sm:$0xff]  }
 0x15d   : > { %1848 = vmatmul.mubr.bf16.gmra.mxu1 %v2856_v33  ;;  %v2910_v52 = vcombine.low %v2269_v41, %v2273_v39  ;;  %v2911_v53 = vcombine.low %v2277_v38, %v2281_v16  ;;  %v2288_v59 = vrot.slane %v3406_v55, 5  ;;  %3217 = vmatprep.subr.bf16.mxu0 %v3394_v42 }
 0x15e   : > { %3207 = vmatprep.mubr.bf16.mxu1 %v2909_v32  ;;  %v2285_v60 = vsel %vm3802_vm8, %v2907_v35, %v2284_v54  ;;  %3218 = vmatpush3.bf16.msra.mxu0 %v3394_v42 }
 0x15f   : > { %v2289_v63 = vsel %vm3802_vm8, %v2908_v48, %v2288_v59  ;;  %3219 = vmatprep.subr.bf16.mxu0 %v3395_v61 }
 0x160   : > { %v2912_v0 = vcombine.low %v2285_v60, %v2289_v63 }
 0x162   : > { %3220 = vmatpush3.bf16.msra.mxu0 %v3395_v61 }
 0x163   : > { %3221 = vmatprep.subr.bf16.mxu0 %v3396_v29 }
 0x165   : > { %3208 = vmatmul.mubr.bf16.vlgmr.msra.gmra.mxu1 %v2910_v52 }
 0x166   : > { %3211 = vmatprep.mubr.bf16.mxu1 %v2911_v53  ;;  %3247 = vmatpush3.bf16.msra.mxu1 %v3393_v4 }
 0x167   : > { %3240 = vmatprep.subr.bf16.mxu1 %v3394_v42  ;;  %3222 = vmatpush3.bf16.msra.mxu0 %v3396_v29 }
 0x168   : > { %3223 = vmatprep.subr.bf16.mxu0 %v3397_v30 }
 0x16a   : > { %3248 = vmatpush3.bf16.msra.mxu1 %v3394_v42 }
 0x16b   : > { %3241 = vmatprep.subr.bf16.mxu1 %v3395_v61  ;;  %3224 = vmatpush3.bf16.msra.mxu0 %v3397_v30 }
 0x16c   : > { %3225 = vmatprep.subr.bf16.mxu0 %v3398_v7 }
 0x16d   : > { %3212 = vmatmul.mubr.bf16.gmra.mxu1 %v2912_v0 }
 0x16e   : > { %3249 = vmatpush3.bf16.msra.mxu1 %v3395_v61 }
 0x16f   : > { %3242 = vmatprep.subr.bf16.mxu1 %v3396_v29  ;;  %3226 = vmatpush3.bf16.msra.mxu0 %v3398_v7 }
 0x170   : > { %3227 = vmatprep.subr.bf16.mxu0 %v3399_v9 }
 0x172   : > { %3250 = vmatpush3.bf16.msra.mxu1 %v3396_v29 }
 0x173   : > { %3243 = vmatprep.subr.bf16.mxu1 %v3397_v30  ;;  %3228 = vmatpush3.bf16.msra.mxu0 %v3399_v9 }
 0x174   : > { %3229 = vmatprep.subr.bf16.mxu0 %v3400_v10 }
 0x176   : > { %3251 = vmatpush3.bf16.msra.mxu1 %v3397_v30 }
 0x177   : > { %3244 = vmatprep.subr.bf16.mxu1 %v3398_v7  ;;  %3230 = vmatpush3.bf16.msra.mxu0 %v3400_v10 }
 0x17a   : > { %3252 = vmatpush3.bf16.msra.mxu1 %v3398_v7 }
 0x17b   : > { %3245 = vmatprep.subr.bf16.mxu1 %v3399_v9 }
 0x17e   : > { %3253 = vmatpush3.bf16.msra.mxu1 %v3399_v9 }
 0x17f   : > { %3246 = vmatprep.subr.bf16.mxu1 %v3400_v10 }
 0x182   : > { %3254 = vmatpush3.bf16.msra.mxu1 %v3400_v10 }
 0x1d5   : > { %v4272_v11 = vpop.f32.mrf.mxu1 }
 0x1d7   : > { %v4274_v12 = vpop.f32.mrf.mxu1 }
 0x1d9   : > { %v4276_v15 = vpop.f32.mrf.mxu1 }
 0x1db   : > { %v4278_v17 = vpop.f32.mrf.mxu1 }
 0x1dd   : > { %v3005_v14 = vpop.f32.mrf.mxu1 }
 0x1de   : > { %v3039_v18 = vpop.f32.mrf.mxu0 }
 0x1df   : > { %v3006_v19 = vpop.f32.mrf.mxu1 }
 0x1e0   : > { %v3040_v22 = vpop.f32.mrf.mxu0  ;;  %v3007_v30 = vadd.f32 %v3006_v19, %v3005_v14 }
 0x1e1   : > { %v4280_v24 = vpop.f32.mrf.mxu1  ;;  %v3041_v61 = vadd.f32 %v3040_v22, %v3039_v18 }
 0x1e2   : > { %v3042_v58 = vpop.f32.mrf.mxu0 }
 0x1e3   : > { %v3009_v56 = vpop.f32.mrf.mxu1 }
 0x1e4   : > { %v3043_v25 = vpop.f32.mrf.mxu0 }
 0x1e5   : > { %v3044_v7 = vadd.f32 %v3043_v25, %v3042_v58 }
 0x1e6   : > { %v3045_v43 = vpop.f32.mrf.mxu0  ;;  %v4282_v5 = vpop.f32.mrf.mxu1 }
 0x1e8   : > { %v3046_v57 = vpop.f32.mrf.mxu0  ;;  %v4284_v27 = vpop.f32.mrf.mxu1 }
 0x1e9   : > { %v3047_v4 = vadd.f32 %v3046_v57, %v3045_v43  ;;  %v3010_v43 = vadd.f32 %v3009_v56, %v4280_v24 }
 0x1ea   : > { %v3048_v2 = vpop.f32.mrf.mxu0  ;;  %v4286_v31 = vpop.f32.mrf.mxu1 }
 0x1ec   : > { %v3049_v6 = vpop.f32.mrf.mxu0  ;;  %v4288_v62 = vpop.f32.mrf.mxu1 }
 0x1ee   : > { %v3051_v50 = vpop.f32.mrf.mxu0  ;;  %v4290_v51 = vpop.f32.mrf.mxu1 }
 0x1f0   : > { %v3052_v21 = vpop.f32.mrf.mxu0  ;;  %v4292_v13 = vpop.f32.mrf.mxu1 }
 0x1f1   : > { %v3053_v58 = vadd.f32 %v3052_v21, %v3051_v50  ;;  %v3019_v56 = vadd.f32 %v4292_v13, %v4290_v51 }
 0x1f2   : > { %v4294_v3 = vpop.f32.mrf.mxu0  ;;  %v4298_v28 = vpop.f32.mrf.mxu1 }
 0x1f3   : > { %4427 = vst [vmem:[#allocation6_spill] sm:$0xff] %v4298_v28 }
 0x1f4   : > { %v4296_v34 = vpop.f32.mrf.mxu0  ;;  %v4300_v37 = vpop.f32.mrf.mxu1 }
 0x1f5   : > { %4428 = vst [vmem:[#allocation7_spill] sm:$0xff] %v4300_v37 }
 0x1f6   : > { %v3057_v8 = vpop.f32.mrf.mxu0 }
 0x1f8   : > { %v3058_v33 = vpop.f32.mrf.mxu0 }
 0x1fa   : > { %v4302_v40 = vpop.f32.mrf.mxu0  ;;  %v4435_v51 = vld [vmem:[#allocation6_spill] sm:$0xff] }
 0x1fb   : > { %4429 = vst [vmem:[#allocation8_spill] sm:$0xff] %v4302_v40  ;;  %v3050_v40 = vadd.f32 %v3049_v6, %v3048_v2  ;;  %v3059_v6 = vadd.f32 %v3058_v33, %v3057_v8 }
 0x1fc   : > { %v4304_v44 = vpop.f32.mrf.mxu0  ;;  %v3079_v32 = vpop.f32.mrf.mxu1  ;;  %v4436_v13 = vld [vmem:[#allocation7_spill] sm:$0xff] }
 0x1fd   : > { %4430 = vst [vmem:[#allocation9_spill] sm:$0xff] %v4304_v44  ;;  %v3001_v44 = vadd.f32 %v4274_v12, %v4272_v11  ;;  %v3022_v33 = vadd.f32 %v4436_v13, %v4435_v51 }
 0x1fe   : > { %v3080_v45 = vpop.f32.mrf.mxu1  ;;  %v3119_v26 = vpop.f32.mrf.mxu0 }
 0x1ff   : > { %v3081_v37 = vadd.f32 %v3080_v45, %v3079_v32 }
 0x200   : > { %v3082_v20 = vpop.f32.mrf.mxu1  ;;  %v3120_v46 = vpop.f32.mrf.mxu0 }
 0x201   : > { %v3121_v18 = vadd.f32 %v3120_v46, %v3119_v26 }
 0x202   : > { %v3122_v1 = vpop.f32.mrf.mxu0  ;;  %v3083_v47 = vpop.f32.mrf.mxu1 }
 0x203   : > { %v3084_v12 = vadd.f32 %v3083_v47, %v3082_v20  ;;  %v4437_v47 = vld [vmem:[#allocation8_spill] sm:$0xff] }
 0x204   : > { %v3123_v23 = vpop.f32.mrf.mxu0 }
 0x205   : > { %v3124_v32 = vadd.f32 %v3123_v23, %v3122_v1  ;;  %v1441_v1 = vadd.f32 %v3059_v6, %v3019_v56  ;;  %v4438_v23 = vld [vmem:[#allocation9_spill] sm:$0xff] }
 0x206   : > { %v3125_v39 = vpop.f32.mrf.mxu0 }
 0x208   : > { %v3085_v36 = vpop.f32.mrf.mxu1  ;;  %v3126_v38 = vpop.f32.mrf.mxu0 }
 0x20a   : > { %v3086_v16 = vpop.f32.mrf.mxu1  ;;  %v3128_v49 = vpop.f32.mrf.mxu0 }
 0x20b   : > { %v3087_v9 = vadd.f32 %v3086_v16, %v3085_v36  ;;  %v1428_v36 = vadd.f32 %v3050_v40, %v3010_v43 }
 0x20c   : > { %v3088_v41 = vpop.f32.mrf.mxu1  ;;  %v3129_v52 = vpop.f32.mrf.mxu0 }
 0x20d   : > { %v3130_v2 = vadd.f32 %v3129_v52, %v3128_v49 }
 0x20e   : > { %v3089_v48 = vpop.f32.mrf.mxu1 }
 0x20f   : > { %v3090_v22 = vadd.f32 %v3089_v48, %v3088_v41 }
 0x211   : > { %v3131_v53 = vpop.f32.mrf.mxu0  ;;  %v1859_v50 = vadd.f32 %v3090_v22, %v1428_v36 }
 0x213   : > { %v3132_v35 = vpop.f32.mrf.mxu0  ;;  %v3091_v54 = vpop.f32.mrf.mxu1  ;;  %v2229_v8 = vadd.f32 %v3130_v2, %v1859_v50 }
 0x215   : > { %v3092_v55 = vpop.f32.mrf.mxu1  ;;  %v4306_v59 = vpop.f32.mrf.mxu0 }
 0x216   : > { %4431 = vst [vmem:[#allocation10_spill] sm:$0xff] %v4306_v59  ;;  %v3004_v59 = vadd.f32 %v4278_v17, %v4276_v15  ;;  %v3013_v15 = vadd.f32 %v4284_v27, %v4282_v5  ;;  %v3016_v17 = vadd.f32 %v4288_v62, %v4286_v31  ;;  %v3093_v46 = vadd.f32 %v3092_v55, %v3091_v54  ;;  %v2921_v31 = vld [vmem:[%s4409_s5] ss:$0 sm:$0xff] }
 0x217   : > { %v4308_v60 = vpop.f32.mrf.mxu1  ;;  %v4312_v0 = vpop.f32.mrf.mxu0 }
 0x218   : > { %4432 = vst [vmem:[#allocation11_spill] sm:$0xff] %v4308_v60  ;;  %4434 = vst [vmem:[#allocation13_spill] sm:$0xff] %v4312_v0  ;;  %v1425_v60 = vadd.f32 %v3047_v4, %v3007_v30  ;;  %v1417_v0 = vadd.f32 %v3041_v61, %v3001_v44  ;;  %v1420_v19 = vadd.f32 %v3044_v7, %v3004_v59  ;;  %v2922_v61 = vld [vmem:[%s4410_s6] ss:$0 sm:$0xff] }
 0x219   : > { %v4310_v63 = vpop.f32.mrf.mxu1  ;;  %v1433_v40 = vadd.f32 %v3053_v58, %v3013_v15 }
 0x21a   : > { %4433 = vst [vmem:[#allocation12_spill] sm:$0xff] %v4310_v63  ;;  %v3127_v63 = vadd.f32 %v3126_v38, %v3125_v39  ;;  %v1858_v25 = vadd.f32 %v3087_v9, %v1425_v60  ;;  %v1856_v11 = vadd.f32 %v3081_v37, %v1417_v0  ;;  %v3056_v37 = vadd.f32 %v4296_v34, %v4294_v3 }
 0x21b   : > { %v3137_v29 = vpop.f32.mrf.mxu0  ;;  %v1857_v27 = vadd.f32 %v3084_v12, %v1420_v19  ;;  %v3062_v39 = vadd.f32 %v4438_v23, %v4437_v47  ;;  %v3133_v34 = vadd.f32 %v3132_v35, %v3131_v53 }
 0x21c   : > { %v2228_v44 = vadd.f32 %v3127_v63, %v1858_v25  ;;  %v2226_v45 = vadd.f32 %v3121_v18, %v1856_v11  ;;  %v1436_v48 = vadd.f32 %v3056_v37, %v3016_v17  ;;  %v1860_v63 = vadd.f32 %v3093_v46, %v1433_v40 }
 0x21d   : > { %v3097_v42 = vpop.f32.mrf.mxu1  ;;  %v3138_v14 = vpop.f32.mrf.mxu0  ;;  %v2227_v52 = vadd.f32 %v3124_v32, %v1857_v27  ;;  %v1444_v53 = vadd.f32 %v3062_v39, %v3022_v33  ;;  %v4441_v35 = vld [vmem:[#allocation10_spill] sm:$0xff] }
 0x21e   : > { %v3139_v38 = vadd.f32 %v3138_v14, %v3137_v29  ;;  %v2230_v19 = vadd.f32 %v3133_v34, %v1860_v63 }
 0x21f   : > { %v3098_v10 = vpop.f32.mrf.mxu1  ;;  %v3140_v21 = vpop.f32.mrf.mxu0  ;;  %v4439_v0 = vld [vmem:[#allocation11_spill] sm:$0xff]  ;;  %v4442_v7 = vld [vmem:[#allocation13_spill] sm:$0xff] }
 0x220   : > { %v3099_v26 = vadd.f32 %v3098_v10, %v3097_v42  ;;  %v3136_v9 = vadd.f32 %v4442_v7, %v4441_v35 }
 0x221   : > { %v3100_v28 = vpop.f32.mrf.mxu1  ;;  %v3141_v49 = vpop.f32.mrf.mxu0  ;;  %v4440_v4 = vld [vmem:[#allocation12_spill] sm:$0xff] }
 0x222   : > { %v1862_v54 = vadd.f32 %v3099_v26, %v1441_v1  ;;  %v3096_v42 = vadd.f32 %v4440_v4, %v4439_v0  ;;  %v3142_v10 = vadd.f32 %v3141_v49, %v3140_v21  ;;  %v3407_v49 = vld [vmem:[%s3594_s21 + $0x8] sm:$0xff]  }
 0x223   : > { %v3101_v57 = vpop.f32.mrf.mxu1 }
 0x224   : > { %v3102_v55 = vadd.f32 %v3101_v57, %v3100_v28  ;;  %v2232_v43 = vadd.f32 %v3139_v38, %v1862_v54  ;;  %v1861_v11 = vadd.f32 %v3096_v42, %v1436_v48 }
 0x225   : > { %v3209_v24 = vpop.f32.mrf.mxu1 }
 0x226   : > { %v2437_v20 = vadd.f32 %v3209_v24, %v2228_v44  ;;  %v1863_v58 = vadd.f32 %v3102_v55, %v1444_v53  ;;  %v2231_v32 = vadd.f32 %v3136_v9, %v1861_v11  ;;  %v3408_v55 = vld [vmem:[%s3594_s21] sm:$0xff]  }
 0x227   : > { %v2404_v5 = vpop.f32.mrf.mxu1  ;;  %v2645_v42 = vunpack.c.h.bf16 %v3408_v55 }
 0x228   : > { %v2435_v62 = vadd.f32 %v2404_v5, %v2226_v45  ;;  %v2452_v59 = vmul.f32 %v2921_v31, %v2437_v20  ;;  %v2233_v17 = vadd.f32 %v3142_v10, %v1863_v58 }
 0x229   : > { %v3210_v3 = vpop.f32.mrf.mxu1 }
 0x22a   : > { %v2450_v16 = vmul.f32 %v2921_v31, %v2435_v62  ;;  %v2438_v41 = vadd.f32 %v3210_v3, %v2229_v8  ;;  %v2467_v25 = vadd.f32 %v2922_v61, %v2452_v59  ;;  %v2932_v3 = vld [vmem:[%s4413_s9] ss:$0 sm:$0xff]  ;;  %v2644_v59 = vunpack.c.l.bf16 %v3408_v55 }
 0x22b   : > { %v2407_v60 = vpop.f32.mrf.mxu1 }
 0x22c   : > { %v2453_v29 = vmul.f32 %v2921_v31, %v2438_v41  ;;  %v2436_v30 = vadd.f32 %v2407_v60, %v2227_v52  ;;  %v2465_v28 = vadd.f32 %v2922_v61, %v2450_v16  ;;  %v2475_v50 = vmax.f32 %v2467_v25, 0.0  ;;  %v3410_v25 = vld [vmem:[%s3594_s21 + $0x18] sm:$0xff]  }
 0x22d   : > { %v3213_v18 = vpop.f32.mrf.mxu1  ;;  %v2646_v41 = vunpack.c.l.bf16 %v3407_v49  ;;  %v2647_v60 = vunpack.c.h.bf16 %v3407_v49 }
 0x22e   : > { %v2468_v22 = vadd.f32 %v2922_v61, %v2453_v29  ;;  %v2451_v14 = vmul.f32 %v2921_v31, %v2436_v30  ;;  %v2441_v57 = vadd.f32 %v3213_v18, %v2232_v43  ;;  %v2473_v44 = vmax.f32 %v2465_v28, 0.0 }
 0x22f   : > { %v2420_v36 = vpop.f32.mrf.mxu1 }
 0x230   : > { %v2466_v12 = vadd.f32 %v2922_v61, %v2451_v14  ;;  %v2439_v2 = vadd.f32 %v2420_v36, %v2230_v19  ;;  %v2476_v15 = vmax.f32 %v2468_v22, 0.0  ;;  %v2456_v21 = vmul.f32 %v2921_v31, %v2441_v57  ;;  %v3409_v19 = vld [vmem:[%s3594_s21 + $0x10] sm:$0xff]   ;;  %s2947_s21 = sshll.u32 %s3553_s17, 9  ;;  %s4364_s17 = scalar_lea.sflag [#allocation4], %s350_s27 }
 0x231   : > { %v3214_v6 = vpop.f32.mrf.mxu1  ;;  %v2648_v58 = vunpack.c.l.bf16 %v3409_v19  ;;  %v2650_v57 = vunpack.c.l.bf16 %v3410_v25  ;;  %s4358_s18 = scalar_lea.hbm %s4414_s10, %s2947_s21 }
 0x232   : > { %v2474_v24 = vmax.f32 %v2466_v12, 0.0  ;;  %v2454_v56 = vmul.f32 %v2921_v31, %v2439_v2  ;;  %v2442_v45 = vadd.f32 %v3214_v6, %v2233_v17  ;;  %v2482_v20 = vpack.c.bf16 %v2476_v15, %v2475_v50 }
 0x233   : > { %v2423_v40 = vpop.f32.mrf.mxu1  ;;  %v2471_v62 = vadd.f32 %v2922_v61, %v2456_v21  ;;  %v2651_v6 = vunpack.c.h.bf16 %v3410_v25 }
 0x234   : > { %v2440_v37 = vadd.f32 %v2423_v40, %v2231_v32  ;;  %v2481_v26 = vpack.c.bf16 %v2474_v24, %v2473_v44  ;;  %v2457_v5 = vmul.f32 %v2921_v31, %v2442_v45  ;;  %v2469_v27 = vadd.f32 %v2922_v61, %v2454_v56 }
 0x235   : > { %v2479_v47 = vmax.f32 %v2471_v62, 0.0  ;;  %v2649_v56 = vunpack.c.h.bf16 %v3409_v19 }
 0x236   : > { %v2455_v46 = vmul.f32 %v2921_v31, %v2440_v37  ;;  %3231 = vmatprep.mubr.bf16.mxu0 %v2481_v26  ;;  %v2472_v8 = vadd.f32 %v2922_v61, %v2457_v5  ;;  %v2477_v33 = vmax.f32 %v2469_v27, 0.0  ;;  %v2931_v31 = vld [vmem:[%s4412_s8] ss:$0 sm:$0xff] }
 0x237   : > { %3232 = vmatmul.mubr.bf16.vlgmr.msra.gmra.mxu0 %v2482_v20 }
 0x238   : > { %v2470_v51 = vadd.f32 %v2922_v61, %v2455_v46  ;;  %v2480_v13 = vmax.f32 %v2472_v8, 0.0 }
 0x23a   : > { %v2478_v1 = vmax.f32 %v2470_v51, 0.0  ;;  %v2484_v39 = vpack.c.bf16 %v2480_v13, %v2479_v47 }
 0x23c   : > { %v2483_v23 = vpack.c.bf16 %v2478_v1, %v2477_v33 }
 0x23e   : > { %3235 = vmatprep.mubr.bf16.mxu1 %v2483_v23 }
 0x23f   : > { %3236 = vmatmul.mubr.bf16.vlgmr.msra.gmra.mxu1 %v2484_v39 }
 0x2f7   : > { %v3233_v38 = vpop.f32.mrf.mxu0 }
 0x2f8   : > { %v2623_v34 = vmul.f32 %v3233_v38, %v2931_v31 }
 0x2f9   : > { %v2583_v16 = vpop.f32.mrf.mxu0 }
 0x2fa   : > { %v2638_v52 = vadd.f32 %v2932_v3, %v2623_v34  ;;  %v2621_v48 = vmul.f32 %v2931_v31, %v2583_v16 }
 0x2fb   : > { %v3234_v54 = vpop.f32.mrf.mxu0 }
 0x2fc   : > { %v2636_v63 = vadd.f32 %v2932_v3, %v2621_v48  ;;  %v2624_v0 = vmul.f32 %v3234_v54, %v2931_v31  ;;  %v2654_v61 = vadd.f32 %v2646_v41, %v2638_v52 }
 0x2fd   : > { %v2586_v4 = vpop.f32.mrf.mxu0 }
 0x2fe   : > { %v2639_v29 = vadd.f32 %v2932_v3, %v2624_v0  ;;  %v2622_v30 = vmul.f32 %v2931_v31, %v2586_v4  ;;  %v2652_v35 = vadd.f32 %v2644_v59, %v2636_v63  ;;  %v2662_v18 = vmax.f32 %v2654_v61, 0.0 }
 0x2ff   : > { %v3237_v53 = vpop.f32.mrf.mxu1 }
 0x300   : > { %v2655_v7 = vadd.f32 %v2647_v60, %v2639_v29  ;;  %v2637_v9 = vadd.f32 %v2932_v3, %v2622_v30  ;;  %v2627_v10 = vmul.f32 %v3237_v53, %v2931_v31  ;;  %v2660_v12 = vmax.f32 %v2652_v35, 0.0 }
 0x301   : > { %v2599_v43 = vpop.f32.mrf.mxu1 }
 0x302   : > { %v2663_v28 = vmax.f32 %v2655_v7, 0.0  ;;  %v2653_v22 = vadd.f32 %v2645_v42, %v2637_v9  ;;  %v2625_v14 = vmul.f32 %v2931_v31, %v2599_v43  ;;  %v2642_v36 = vadd.f32 %v2932_v3, %v2627_v10 }
 0x303   : > { %v3238_v11 = vpop.f32.mrf.mxu1 }
 0x304   : > { %v2956_v2 = vpack.c.bf16 %v2663_v28, %v2662_v18  ;;  %v2661_v15 = vmax.f32 %v2653_v22, 0.0  ;;  %v2640_v17 = vadd.f32 %v2932_v3, %v2625_v14  ;;  %v2628_v44 = vmul.f32 %v3238_v11, %v2931_v31 }
 0x305   : > { %v2602_v24 = vpop.f32.mrf.mxu1  ;;  %v2658_v21 = vadd.f32 %v2650_v57, %v2642_v36 }
 0x306   : > { %2968 = vst [vmem:[%s352_s29 + $0x8] sm:$0xff] %v2956_v2   ;;  %v2951_v32 = vpack.c.bf16 %v2661_v15, %v2660_v12  ;;  %v2626_v50 = vmul.f32 %v2931_v31, %v2602_v24  ;;  %v2643_v45 = vadd.f32 %v2932_v3, %v2628_v44  ;;  %v2656_v40 = vadd.f32 %v2648_v58, %v2640_v17 }
 0x307   : > { %v2666_v5 = vmax.f32 %v2658_v21, 0.0 }
 0x308   : > { %2952 = vst [vmem:[%s352_s29] sm:$0xff] %v2951_v32   ;;  %v2641_v37 = vadd.f32 %v2932_v3, %v2626_v50  ;;  %v2659_v26 = vadd.f32 %v2651_v6, %v2643_v45  ;;  %v2664_v46 = vmax.f32 %v2656_v40, 0.0 }
 0x30a   : > { %v2657_v20 = vadd.f32 %v2649_v56, %v2641_v37  ;;  %v2667_v27 = vmax.f32 %v2659_v26, 0.0 }
 0x30c   : > { %v2665_v62 = vmax.f32 %v2657_v20, 0.0  ;;  %v2966_v8 = vpack.c.bf16 %v2667_v27, %v2666_v5 }
 0x30e   : > { %v2961_v51 = vpack.c.bf16 %v2665_v62, %v2664_v46  ;;  %2970 = vst [vmem:[%s352_s29 + $0x18] sm:$0xff] %v2966_v8  }
 0x310   : > { %2969 = vst [vmem:[%s352_s29 + $0x10] sm:$0xff] %v2961_v51  }
 0x311   : > { %3424 = shalt.err (!%p3421_p3)
}
 0x312   : > { %s3425_s27 = scalar_lea.hbm %s4358_s18, 512  ;;  %s3429_s11 = scalar_lea.hbm %s4414_s10, 1024 }
 0x313   : > { %p3426_p4 = scmp.ne.s32.totalorder %s4358_s18, %s3425_s27  ;;  %p3430_p9 = scmp.lt.s32.totalorder %s4358_s18, %s4414_s10 }
 0x314   : > { %p3431_p10 = scmp.lt.s32.totalorder %s3429_s11, %s3425_s27 }
 0x315   : > { %p3427_p7 = pnand %p3426_p4, %p3570_p5 }
 0x316   : > { %p3432_p11 = por %p3431_p10, %p3430_p9 }
 0x317   : > { %p3428_p8 = pneg %p3427_p7 }
 0x319   : > { %p3433_p12 = pnand %p3432_p11, %p3428_p8 }
 0x31b   : > { %3436 = shalt.err (!%p3433_p12)
}
 0x31c   : > { %s3475_s20 = smov 64   ;;  %s3476_s26 = smov 4  }
 0x31d   : > { %3255 = dma.vmem_to_hbm [thread:$0]  (%p3570_p5), %s4360_s30, 512, %s4358_s18, %s4364_s17, %s3475_s20, %s3475_s20, %s3476_s26  }
 0x31e PF: > { %p3261_p13 = scmp.ge.s32.totalorder %s3471_s16, 2  ;;  %s2713_s28 = sand.u32 1, %s3459_s13  }
 0x31f   : > { %s2714_s27 = scalar_lea.sflag [#allocation4], %s2713_s28 }
 0x320   : > { %p3258_p0 = pnand %p3261_p13, %p3574_p6 }
 0x322   : > { %p3259_p1 = pneg %p3258_p0 }
 0x324   : > { %3454 = dma.done.wait (%p3259_p1), %s2714_s27, 512  }
 0x325   : > { %3456 = vsyncadd (%p3259_p1), %s2714_s27, 4294966784  ;;  %p20_p2 = scmp.ge.s32.totalorder %s3557_s19, 4   ;;  %s4443_s13 = smov %s3463_s14 }
 0x326   : > { %s4444_s14 = smov %s3467_s15  ;;  %s4445_s15 = smov %s3568_s22 }
 0x327   : > { %s4446_s16 = smov %s3557_s19  ;;  %22 = sbr.rel (!%p20_p2) target bundleno = 3 (0x3), region = 98 }
 0x32c   :  { %2719 = vsyncpa [#allocation4], 1 }
 0x32d   :  { %2721 = vsyncpa [#allocation4 + $0x1], 1 }

</bundles_post_ra>
